<compile_context>
chip_gen: v7x
topology: tpu7x:2x2x1
jax: 0.10.0
libtpu: 0.0.40
codegen_flags: <defaults>
</compile_context>

<pallas_src>
import jax
import jax.numpy as jnp
from jax.experimental import pallas as pl
from jax.experimental.pallas import tpu as pltpu

CLASSES = 32
IMG_H, IMG_W = 16, 16
IN_CH = 3
LATENT_DIM = IMG_H * IMG_W * IN_CH          # 768
GEN_IN = LATENT_DIM + CLASSES               # 800
DIMS = [GEN_IN, 128, 256, 512, 1024, IMG_H * IMG_W]
BN_EPS = 0.8
LRELU_SLOPE = 0.2


# ----------------------------------------------------------------------------
# Pallas kernel: the whole MLP hot path (5 matmuls + BN + LeakyReLU + Tanh).
# Everything fits in VMEM, so the grid is trivial; the batch-norm needs the
# full batch in one block anyway (reduction over the batch/sublane axis).
# w4/w5 arrive via manual async DMA overlapped with the earlier blocks.
# ----------------------------------------------------------------------------
def _generator_mlp_kernel(noise_ref, t1_ref,
                          w1n_ref,
                          w2_ref, g2_ref, bt2_ref,
                          w3_ref, g3_ref, bt3_ref,
                          w4_hbm_ref, g4_ref, bt4_ref,
                          w5_hbm_ref, b5_ref,
                          out_ref,
                          w4_vmem, w5_vmem, dma_sems):
    # Kick off prefetch of the two big weights so their HBM->VMEM transfer
    # overlaps with blocks 1-3.
    cp4 = pltpu.make_async_copy(w4_hbm_ref, w4_vmem, dma_sems.at[0])
    cp5 = pltpu.make_async_copy(w5_hbm_ref, w5_vmem, dma_sems.at[1])
    cp4.start()
    cp5.start()

    def leaky(h):
        return jnp.where(h > 0, h, LRELU_SLOPE * h)

    def batchnorm(h, gamma, beta):
        # training-mode BatchNorm1d: biased batch statistics, eps = 0.8
        mean = jnp.mean(h, axis=0, keepdims=True)
        var = jnp.mean((h - mean) * (h - mean), axis=0, keepdims=True)
        return (h - mean) * jax.lax.rsqrt(var + BN_EPS) * gamma + beta

    # block 1 (no norm): noise @ W1[32:] ; the label-embedding contribution and
    # b1 are folded into t1 (computed in glue).
    h = jnp.dot(noise_ref[...], w1n_ref[...],
                preferred_element_type=jnp.float32) + t1_ref[...]
    h = leaky(h)

    # block 2 (linear bias omitted: exactly cancelled by the BN mean subtraction)
    h = jnp.dot(h.astype(jnp.bfloat16), w2_ref[...],
                preferred_element_type=jnp.float32)
    h = leaky(batchnorm(h, g2_ref[...], bt2_ref[...]))

    # block 3
    h = jnp.dot(h.astype(jnp.bfloat16), w3_ref[...],
                preferred_element_type=jnp.float32)
    h = leaky(batchnorm(h, g3_ref[...], bt3_ref[...]))

    # block 4 (weight delivered by the manual prefetch)
    cp4.wait()
    h = jnp.dot(h.astype(jnp.bfloat16), w4_vmem[...],
                preferred_element_type=jnp.float32)
    h = leaky(batchnorm(h, g4_ref[...], bt4_ref[...]))

    # output head
    cp5.wait()
    h = jnp.dot(h.astype(jnp.bfloat16), w5_vmem[...],
                preferred_element_type=jnp.float32) + b5_ref[...]
    out_ref[...] = jnp.tanh(h)


def generator2_forward(params, noise, labels):
    """Forward pass matching Generator2.forward (training-mode BN, bf16 weights)."""
    # Glue: fold the embedding through the first 32 rows of W1 (exact algebra)
    # and gather per-row; also folds b1.  Tiny (B,32)@(32,128) work.
    emb = jnp.take(params["emb"], labels, axis=0).astype(jnp.bfloat16)     # (B,32)
    t1 = jnp.dot(emb, params["w1e"],
                 preferred_element_type=jnp.float32) + params["b1"]        # (B,128) f32
    noise_bf16 = noise.astype(jnp.bfloat16)                                # (B,768)

    batch = noise.shape[0]
    operands = (
        noise_bf16, t1,
        params["w1n"],
        params["w2"], params["g2"], params["bt2"],
        params["w3"], params["g3"], params["bt3"],
        params["w4"], params["g4"], params["bt4"],
        params["w5"], params["b5"],
    )
    MANUAL_DMA_IDX = (9, 12)   # w4, w5 stay in HBM; kernel DMAs them itself.

    def full_spec(arr):
        # full-array block, single grid step
        return pl.BlockSpec(arr.shape, lambda i: (0,) * arr.ndim)

    in_specs = [
        pl.BlockSpec(memory_space=pl.ANY) if idx in MANUAL_DMA_IDX else full_spec(a)
        for idx, a in enumerate(operands)
    ]

    out = pl.pallas_call(
        _generator_mlp_kernel,
        out_shape=jax.ShapeDtypeStruct((batch, IMG_H * IMG_W), jnp.float32),
        grid=(1,),
        in_specs=in_specs,
        out_specs=pl.BlockSpec((batch, IMG_H * IMG_W), lambda i: (0, 0)),
        scratch_shapes=[
            pltpu.VMEM((DIMS[3], DIMS[4]), jnp.bfloat16),   # w4 buffer (512,1024)
            pltpu.VMEM((DIMS[4], DIMS[5]), jnp.bfloat16),   # w5 buffer (1024,256)
            pltpu.SemaphoreType.DMA((2,)),
        ],
        compiler_params=pltpu.CompilerParams(
            dimension_semantics=("arbitrary",),
        ),
    )(*operands)

    return out.reshape(batch, IMG_H, IMG_W)


# ----------------------------------------------------------------------------
# Deterministic parameter init (PyTorch-default-style, synthetic).
# Weights are stored in bf16 (the kernel is DMA-bound); biases / BN affine in f32.
# ----------------------------------------------------------------------------
def init_params(key):
    params = {}
    key, k_emb = jax.random.split(key)
    # nn.Embedding default: N(0, 1)
    params["emb"] = jax.random.normal(k_emb, (CLASSES, CLASSES), jnp.float32)

    def linear(key, fan_in, fan_out):
        kw, kb = jax.random.split(key)
        bound = 1.0 / jnp.sqrt(fan_in)
        # stored as (in, out) so the kernel computes x @ W  (== PyTorch x @ W.T)
        w = jax.random.uniform(kw, (fan_in, fan_out), jnp.float32, -bound, bound)
        b = jax.random.uniform(kb, (1, fan_out), jnp.float32, -bound, bound)
        return w, b

    ws = {}
    for i in range(5):
        key, k = jax.random.split(key)
        w, b = linear(k, DIMS[i], DIMS[i + 1])
        ws[i + 1] = w
        params[f"b{i + 1}"] = b     # b2..b4 only used by the reference (exact no-op pre-BN)

    # W1 split: rows that multiply the embedding vs. the noise.
    params["w1e"] = ws[1][:CLASSES].astype(jnp.bfloat16)       # (32, 128)
    params["w1n"] = ws[1][CLASSES:].astype(jnp.bfloat16)       # (768, 128)
    for i in (2, 3, 4, 5):
        params[f"w{i}"] = ws[i].astype(jnp.bfloat16)

    # BatchNorm affine params for layers 2..4: gamma=1, beta=0 (fresh module)
    for i, d in zip((2, 3, 4), (256, 512, 1024)):
        params[f"g{i}"] = jnp.ones((1, d), jnp.float32)
        params[f"bt{i}"] = jnp.zeros((1, d), jnp.float32)
    return params


# ----------------------------------------------------------------------------
# Pure-JAX reference at matching precision (bf16 weights, f32 accumulation),
# following the original module structure (concat input, biases before BN).
# ----------------------------------------------------------------------------
def reference_forward(params, noise, labels):
    w1 = jnp.concatenate([params["w1e"], params["w1n"]], axis=0)   # (800,128) bf16
    emb = jnp.take(params["emb"], labels, axis=0)
    h = jnp.concatenate([emb, noise], axis=-1)                     # (B, 800)

    def dot(x, w):
        return jnp.dot(x.astype(jnp.bfloat16), w, preferred_element_type=jnp.float32)

    def leaky(x):
        return jnp.where(x > 0, x, LRELU_SLOPE * x)

    def bn(x, g, b):
        m = jnp.mean(x, axis=0, keepdims=True)
        v = jnp.mean((x - m) ** 2, axis=0, keepdims=True)
        return (x - m) * jax.lax.rsqrt(v + BN_EPS) * g + b

    h = leaky(dot(h, w1) + params["b1"])
    h = leaky(bn(dot(h, params["w2"]) + params["b2"], params["g2"], params["bt2"]))
    h = leaky(bn(dot(h, params["w3"]) + params["b3"], params["g3"], params["bt3"]))
    h = leaky(bn(dot(h, params["w4"]) + params["b4"], params["g4"], params["bt4"]))
    h = jnp.tanh(dot(h, params["w5"]) + params["b5"])
    return h.reshape(h.shape[0], IMG_H, IMG_W)


if __name__ == "__main__":
    key = jax.random.PRNGKey(0)
    key, k_params, k_noise, k_labels = jax.random.split(key, 4)

    params = init_params(k_params)

    batch = 8
    noise = jax.random.normal(k_noise, (batch, LATENT_DIM), jnp.float32)
    labels = jax.random.randint(k_labels, (batch,), 0, CLASSES, jnp.int32)

    img = jax.jit(generator2_forward)(params, noise, labels)
    img = jax.block_until_ready(img)

    ref = reference_forward(params, noise, labels)
    assert img.shape == (batch, IMG_H, IMG_W), img.shape
    max_err = float(jnp.max(jnp.abs(img - ref)))
    assert max_err < 1e-2, max_err   # bf16-weight path; outputs are tanh-bounded

    print("KERNEL_OK")
</pallas_src>

<mosaic_0001>
module attributes {stable_mosaic.version = 11 : i64} {
  func.func @_generator_mlp_kernel(%arg0: i32, %arg1: memref<8x768xbf16, #tpu.memory_space<vmem>>, %arg2: memref<8x128xf32, #tpu.memory_space<vmem>>, %arg3: memref<768x128xbf16, #tpu.memory_space<vmem>>, %arg4: memref<128x256xbf16, #tpu.memory_space<vmem>>, %arg5: memref<1x256xf32, #tpu.memory_space<vmem>>, %arg6: memref<1x256xf32, #tpu.memory_space<vmem>>, %arg7: memref<256x512xbf16, #tpu.memory_space<vmem>>, %arg8: memref<1x512xf32, #tpu.memory_space<vmem>>, %arg9: memref<1x512xf32, #tpu.memory_space<vmem>>, %arg10: memref<512x1024xbf16, #tpu.memory_space<any>>, %arg11: memref<1x1024xf32, #tpu.memory_space<vmem>>, %arg12: memref<1x1024xf32, #tpu.memory_space<vmem>>, %arg13: memref<1024x256xbf16, #tpu.memory_space<any>>, %arg14: memref<1x256xf32, #tpu.memory_space<vmem>>, %arg15: memref<8x256xf32, #tpu.memory_space<vmem>>, %arg16: memref<512x1024xbf16, #tpu.memory_space<vmem>>, %arg17: memref<1024x256xbf16, #tpu.memory_space<vmem>>, %arg18: memref<2x!tpu.dma_semaphore, #tpu.memory_space<semaphore_mem>>) attributes {dimension_semantics = [#tpu.dimension_semantics<arbitrary>], iteration_bounds = array<i64: 1>, scalar_prefetch = 0 : i64, scratch_operands = 3 : i64, tpu.core_type = #tpu.core_type<tc>, window_params = [{pipeline_mode = #tpu.pipeline_mode<synchronous>, transform_indices = @transform_0, window_bounds = array<i64: 8, 768>}, {pipeline_mode = #tpu.pipeline_mode<synchronous>, transform_indices = @transform_1, window_bounds = array<i64: 8, 128>}, {pipeline_mode = #tpu.pipeline_mode<synchronous>, transform_indices = @transform_2, window_bounds = array<i64: 768, 128>}, {pipeline_mode = #tpu.pipeline_mode<synchronous>, transform_indices = @transform_3, window_bounds = array<i64: 128, 256>}, {pipeline_mode = #tpu.pipeline_mode<synchronous>, transform_indices = @transform_4, window_bounds = array<i64: 1, 256>}, {pipeline_mode = #tpu.pipeline_mode<synchronous>, transform_indices = @transform_5, window_bounds = array<i64: 1, 256>}, {pipeline_mode = #tpu.pipeline_mode<synchronous>, transform_indices = @transform_6, window_bounds = array<i64: 256, 512>}, {pipeline_mode = #tpu.pipeline_mode<synchronous>, transform_indices = @transform_7, window_bounds = array<i64: 1, 512>}, {pipeline_mode = #tpu.pipeline_mode<synchronous>, transform_indices = @transform_8, window_bounds = array<i64: 1, 512>}, {}, {pipeline_mode = #tpu.pipeline_mode<synchronous>, transform_indices = @transform_10, window_bounds = array<i64: 1, 1024>}, {pipeline_mode = #tpu.pipeline_mode<synchronous>, transform_indices = @transform_11, window_bounds = array<i64: 1, 1024>}, {}, {pipeline_mode = #tpu.pipeline_mode<synchronous>, transform_indices = @transform_13, window_bounds = array<i64: 1, 256>}, {pipeline_mode = #tpu.pipeline_mode<synchronous>, transform_indices = @transform_14, window_bounds = array<i64: 8, 256>}]} {
    %c0_i32 = arith.constant 0 : i32
    %0 = tpu.memref_slice %arg18[%c0_i32] : memref<2x!tpu.dma_semaphore, #tpu.memory_space<semaphore_mem>> -> memref<1x!tpu.dma_semaphore, #tpu.memory_space<semaphore_mem>>
    %1 = tpu.memref_squeeze %0 : memref<1x!tpu.dma_semaphore, #tpu.memory_space<semaphore_mem>> -> memref<!tpu.dma_semaphore, #tpu.memory_space<semaphore_mem>>
    tpu.enqueue_dma source(%arg10 : memref<512x1024xbf16, #tpu.memory_space<any>>) target(%arg16 : memref<512x1024xbf16, #tpu.memory_space<vmem>>) target_semaphore(%1 : memref<!tpu.dma_semaphore, #tpu.memory_space<semaphore_mem>>)
    %c1_i32 = arith.constant 1 : i32
    %2 = tpu.memref_slice %arg18[%c1_i32] : memref<2x!tpu.dma_semaphore, #tpu.memory_space<semaphore_mem>> -> memref<1x!tpu.dma_semaphore, #tpu.memory_space<semaphore_mem>>
    %3 = tpu.memref_squeeze %2 : memref<1x!tpu.dma_semaphore, #tpu.memory_space<semaphore_mem>> -> memref<!tpu.dma_semaphore, #tpu.memory_space<semaphore_mem>>
    tpu.enqueue_dma source(%arg13 : memref<1024x256xbf16, #tpu.memory_space<any>>) target(%arg17 : memref<1024x256xbf16, #tpu.memory_space<vmem>>) target_semaphore(%3 : memref<!tpu.dma_semaphore, #tpu.memory_space<semaphore_mem>>)
    %c0 = arith.constant 0 : index
    %c0_0 = arith.constant 0 : index
    %4 = vector.load %arg1[%c0, %c0_0] : memref<8x768xbf16, #tpu.memory_space<vmem>>, vector<8x768xbf16>
    %c0_1 = arith.constant 0 : index
    %c0_2 = arith.constant 0 : index
    %5 = vector.load %arg3[%c0_1, %c0_2] : memref<768x128xbf16, #tpu.memory_space<vmem>>, vector<768x128xbf16>
    %cst = arith.constant dense<0.000000e+00> : vector<8x128xf32>
    %6 = tpu.matmul %4, %5, %cst {dimension_numbers = #tpu.dot_dimension_numbers<[1], [0], [0], [1], [0, 0, 1, 1], [], []>} : vector<8x768xbf16>, vector<768x128xbf16>, vector<8x128xf32> -> vector<8x128xf32>
    %c0_3 = arith.constant 0 : index
    %c0_4 = arith.constant 0 : index
    %7 = vector.load %arg2[%c0_3, %c0_4] : memref<8x128xf32, #tpu.memory_space<vmem>>, vector<8x128xf32>
    %8 = arith.addf %6, %7 : vector<8x128xf32>
    %cst_5 = arith.constant 0.000000e+00 : f32
    %9 = vector.broadcast %cst_5 : f32 to vector<8x128xf32>
    %10 = arith.cmpf ogt, %8, %9 : vector<8x128xf32>
    %cst_6 = arith.constant 2.000000e-01 : f32
    %11 = vector.broadcast %cst_6 : f32 to vector<8x128xf32>
    %12 = arith.mulf %11, %8 : vector<8x128xf32>
    %13 = arith.select %10, %8, %12 : vector<8x128xi1>, vector<8x128xf32>
    %14 = arith.truncf %13 : vector<8x128xf32> to vector<8x128xbf16>
    %c0_7 = arith.constant 0 : index
    %c0_8 = arith.constant 0 : index
    %15 = vector.load %arg4[%c0_7, %c0_8] : memref<128x256xbf16, #tpu.memory_space<vmem>>, vector<128x256xbf16>
    %cst_9 = arith.constant dense<0.000000e+00> : vector<8x256xf32>
    %16 = tpu.matmul %14, %15, %cst_9 {dimension_numbers = #tpu.dot_dimension_numbers<[1], [0], [0], [1], [0, 0, 1, 1], [], []>} : vector<8x128xbf16>, vector<128x256xbf16>, vector<8x256xf32> -> vector<8x256xf32>
    %c0_10 = arith.constant 0 : index
    %c0_11 = arith.constant 0 : index
    %17 = vector.load %arg5[%c0_10, %c0_11] : memref<1x256xf32, #tpu.memory_space<vmem>>, vector<1x256xf32>
    %c0_12 = arith.constant 0 : index
    %c0_13 = arith.constant 0 : index
    %18 = vector.load %arg6[%c0_12, %c0_13] : memref<1x256xf32, #tpu.memory_space<vmem>>, vector<1x256xf32>
    %cst_14 = arith.constant dense<0.000000e+00> : vector<256xf32>
    %19 = vector.multi_reduction <add>, %16, %cst_14 [0] : vector<8x256xf32> to vector<256xf32>
    %20 = vector.shape_cast %19 : vector<256xf32> to vector<1x256xf32>
    %cst_15 = arith.constant 8.000000e+00 : f32
    %21 = vector.broadcast %cst_15 : f32 to vector<1x256xf32>
    %22 = arith.divf %20, %21 : vector<1x256xf32>
    %23 = vector.broadcast %22 : vector<1x256xf32> to vector<8x256xf32>
    %24 = arith.subf %16, %23 : vector<8x256xf32>
    %25 = vector.broadcast %22 : vector<1x256xf32> to vector<8x256xf32>
    %26 = arith.subf %16, %25 : vector<8x256xf32>
    %27 = arith.mulf %24, %26 : vector<8x256xf32>
    %cst_16 = arith.constant dense<0.000000e+00> : vector<256xf32>
    %28 = vector.multi_reduction <add>, %27, %cst_16 [0] : vector<8x256xf32> to vector<256xf32>
    %29 = vector.shape_cast %28 : vector<256xf32> to vector<1x256xf32>
    %cst_17 = arith.constant 8.000000e+00 : f32
    %30 = vector.broadcast %cst_17 : f32 to vector<1x256xf32>
    %31 = arith.divf %29, %30 : vector<1x256xf32>
    %32 = vector.broadcast %22 : vector<1x256xf32> to vector<8x256xf32>
    %33 = arith.subf %16, %32 : vector<8x256xf32>
    %cst_18 = arith.constant 8.000000e-01 : f32
    %34 = vector.broadcast %cst_18 : f32 to vector<1x256xf32>
    %35 = arith.addf %31, %34 : vector<1x256xf32>
    %36 = math.rsqrt %35 : vector<1x256xf32>
    %37 = vector.broadcast %36 : vector<1x256xf32> to vector<8x256xf32>
    %38 = arith.mulf %33, %37 : vector<8x256xf32>
    %39 = vector.broadcast %17 : vector<1x256xf32> to vector<8x256xf32>
    %40 = arith.mulf %38, %39 : vector<8x256xf32>
    %41 = vector.broadcast %18 : vector<1x256xf32> to vector<8x256xf32>
    %42 = arith.addf %40, %41 : vector<8x256xf32>
    %cst_19 = arith.constant 0.000000e+00 : f32
    %43 = vector.broadcast %cst_19 : f32 to vector<8x256xf32>
    %44 = arith.cmpf ogt, %42, %43 : vector<8x256xf32>
    %cst_20 = arith.constant 2.000000e-01 : f32
    %45 = vector.broadcast %cst_20 : f32 to vector<8x256xf32>
    %46 = arith.mulf %45, %42 : vector<8x256xf32>
    %47 = arith.select %44, %42, %46 : vector<8x256xi1>, vector<8x256xf32>
    %48 = arith.truncf %47 : vector<8x256xf32> to vector<8x256xbf16>
    %c0_21 = arith.constant 0 : index
    %c0_22 = arith.constant 0 : index
    %49 = vector.load %arg7[%c0_21, %c0_22] : memref<256x512xbf16, #tpu.memory_space<vmem>>, vector<256x512xbf16>
    %cst_23 = arith.constant dense<0.000000e+00> : vector<8x512xf32>
    %50 = tpu.matmul %48, %49, %cst_23 {dimension_numbers = #tpu.dot_dimension_numbers<[1], [0], [0], [1], [0, 0, 1, 1], [], []>} : vector<8x256xbf16>, vector<256x512xbf16>, vector<8x512xf32> -> vector<8x512xf32>
    %c0_24 = arith.constant 0 : index
    %c0_25 = arith.constant 0 : index
    %51 = vector.load %arg8[%c0_24, %c0_25] : memref<1x512xf32, #tpu.memory_space<vmem>>, vector<1x512xf32>
    %c0_26 = arith.constant 0 : index
    %c0_27 = arith.constant 0 : index
    %52 = vector.load %arg9[%c0_26, %c0_27] : memref<1x512xf32, #tpu.memory_space<vmem>>, vector<1x512xf32>
    %cst_28 = arith.constant dense<0.000000e+00> : vector<512xf32>
    %53 = vector.multi_reduction <add>, %50, %cst_28 [0] : vector<8x512xf32> to vector<512xf32>
    %54 = vector.shape_cast %53 : vector<512xf32> to vector<1x512xf32>
    %cst_29 = arith.constant 8.000000e+00 : f32
    %55 = vector.broadcast %cst_29 : f32 to vector<1x512xf32>
    %56 = arith.divf %54, %55 : vector<1x512xf32>
    %57 = vector.broadcast %56 : vector<1x512xf32> to vector<8x512xf32>
    %58 = arith.subf %50, %57 : vector<8x512xf32>
    %59 = vector.broadcast %56 : vector<1x512xf32> to vector<8x512xf32>
    %60 = arith.subf %50, %59 : vector<8x512xf32>
    %61 = arith.mulf %58, %60 : vector<8x512xf32>
    %cst_30 = arith.constant dense<0.000000e+00> : vector<512xf32>
    %62 = vector.multi_reduction <add>, %61, %cst_30 [0] : vector<8x512xf32> to vector<512xf32>
    %63 = vector.shape_cast %62 : vector<512xf32> to vector<1x512xf32>
    %cst_31 = arith.constant 8.000000e+00 : f32
    %64 = vector.broadcast %cst_31 : f32 to vector<1x512xf32>
    %65 = arith.divf %63, %64 : vector<1x512xf32>
    %66 = vector.broadcast %56 : vector<1x512xf32> to vector<8x512xf32>
    %67 = arith.subf %50, %66 : vector<8x512xf32>
    %cst_32 = arith.constant 8.000000e-01 : f32
    %68 = vector.broadcast %cst_32 : f32 to vector<1x512xf32>
    %69 = arith.addf %65, %68 : vector<1x512xf32>
    %70 = math.rsqrt %69 : vector<1x512xf32>
    %71 = vector.broadcast %70 : vector<1x512xf32> to vector<8x512xf32>
    %72 = arith.mulf %67, %71 : vector<8x512xf32>
    %73 = vector.broadcast %51 : vector<1x512xf32> to vector<8x512xf32>
    %74 = arith.mulf %72, %73 : vector<8x512xf32>
    %75 = vector.broadcast %52 : vector<1x512xf32> to vector<8x512xf32>
    %76 = arith.addf %74, %75 : vector<8x512xf32>
    %cst_33 = arith.constant 0.000000e+00 : f32
    %77 = vector.broadcast %cst_33 : f32 to vector<8x512xf32>
    %78 = arith.cmpf ogt, %76, %77 : vector<8x512xf32>
    %cst_34 = arith.constant 2.000000e-01 : f32
    %79 = vector.broadcast %cst_34 : f32 to vector<8x512xf32>
    %80 = arith.mulf %79, %76 : vector<8x512xf32>
    %81 = arith.select %78, %76, %80 : vector<8x512xi1>, vector<8x512xf32>
    %c0_i32_35 = arith.constant 0 : i32
    %82 = tpu.memref_slice %arg18[%c0_i32_35] : memref<2x!tpu.dma_semaphore, #tpu.memory_space<semaphore_mem>> -> memref<1x!tpu.dma_semaphore, #tpu.memory_space<semaphore_mem>>
    %83 = tpu.memref_squeeze %82 : memref<1x!tpu.dma_semaphore, #tpu.memory_space<semaphore_mem>> -> memref<!tpu.dma_semaphore, #tpu.memory_space<semaphore_mem>>
    tpu.wait_dma2 semaphore(%83 : memref<!tpu.dma_semaphore, #tpu.memory_space<semaphore_mem>>) src(%arg10 : memref<512x1024xbf16, #tpu.memory_space<any>>) dst(%arg16 : memref<512x1024xbf16, #tpu.memory_space<vmem>>)
    %84 = arith.truncf %81 : vector<8x512xf32> to vector<8x512xbf16>
    %c0_36 = arith.constant 0 : index
    %c0_37 = arith.constant 0 : index
    %85 = vector.load %arg16[%c0_36, %c0_37] : memref<512x1024xbf16, #tpu.memory_space<vmem>>, vector<512x1024xbf16>
    %cst_38 = arith.constant dense<0.000000e+00> : vector<8x1024xf32>
    %86 = tpu.matmul %84, %85, %cst_38 {dimension_numbers = #tpu.dot_dimension_numbers<[1], [0], [0], [1], [0, 0, 1, 1], [], []>} : vector<8x512xbf16>, vector<512x1024xbf16>, vector<8x1024xf32> -> vector<8x1024xf32>
    %c0_39 = arith.constant 0 : index
    %c0_40 = arith.constant 0 : index
    %87 = vector.load %arg11[%c0_39, %c0_40] : memref<1x1024xf32, #tpu.memory_space<vmem>>, vector<1x1024xf32>
    %c0_41 = arith.constant 0 : index
    %c0_42 = arith.constant 0 : index
    %88 = vector.load %arg12[%c0_41, %c0_42] : memref<1x1024xf32, #tpu.memory_space<vmem>>, vector<1x1024xf32>
    %cst_43 = arith.constant dense<0.000000e+00> : vector<1024xf32>
    %89 = vector.multi_reduction <add>, %86, %cst_43 [0] : vector<8x1024xf32> to vector<1024xf32>
    %90 = vector.shape_cast %89 : vector<1024xf32> to vector<1x1024xf32>
    %cst_44 = arith.constant 8.000000e+00 : f32
    %91 = vector.broadcast %cst_44 : f32 to vector<1x1024xf32>
    %92 = arith.divf %90, %91 : vector<1x1024xf32>
    %93 = vector.broadcast %92 : vector<1x1024xf32> to vector<8x1024xf32>
    %94 = arith.subf %86, %93 : vector<8x1024xf32>
    %95 = vector.broadcast %92 : vector<1x1024xf32> to vector<8x1024xf32>
    %96 = arith.subf %86, %95 : vector<8x1024xf32>
    %97 = arith.mulf %94, %96 : vector<8x1024xf32>
    %cst_45 = arith.constant dense<0.000000e+00> : vector<1024xf32>
    %98 = vector.multi_reduction <add>, %97, %cst_45 [0] : vector<8x1024xf32> to vector<1024xf32>
    %99 = vector.shape_cast %98 : vector<1024xf32> to vector<1x1024xf32>
    %cst_46 = arith.constant 8.000000e+00 : f32
    %100 = vector.broadcast %cst_46 : f32 to vector<1x1024xf32>
    %101 = arith.divf %99, %100 : vector<1x1024xf32>
    %102 = vector.broadcast %92 : vector<1x1024xf32> to vector<8x1024xf32>
    %103 = arith.subf %86, %102 : vector<8x1024xf32>
    %cst_47 = arith.constant 8.000000e-01 : f32
    %104 = vector.broadcast %cst_47 : f32 to vector<1x1024xf32>
    %105 = arith.addf %101, %104 : vector<1x1024xf32>
    %106 = math.rsqrt %105 : vector<1x1024xf32>
    %107 = vector.broadcast %106 : vector<1x1024xf32> to vector<8x1024xf32>
    %108 = arith.mulf %103, %107 : vector<8x1024xf32>
    %109 = vector.broadcast %87 : vector<1x1024xf32> to vector<8x1024xf32>
    %110 = arith.mulf %108, %109 : vector<8x1024xf32>
    %111 = vector.broadcast %88 : vector<1x1024xf32> to vector<8x1024xf32>
    %112 = arith.addf %110, %111 : vector<8x1024xf32>
    %cst_48 = arith.constant 0.000000e+00 : f32
    %113 = vector.broadcast %cst_48 : f32 to vector<8x1024xf32>
    %114 = arith.cmpf ogt, %112, %113 : vector<8x1024xf32>
    %cst_49 = arith.constant 2.000000e-01 : f32
    %115 = vector.broadcast %cst_49 : f32 to vector<8x1024xf32>
    %116 = arith.mulf %115, %112 : vector<8x1024xf32>
    %117 = arith.select %114, %112, %116 : vector<8x1024xi1>, vector<8x1024xf32>
    %c1_i32_50 = arith.constant 1 : i32
    %118 = tpu.memref_slice %arg18[%c1_i32_50] : memref<2x!tpu.dma_semaphore, #tpu.memory_space<semaphore_mem>> -> memref<1x!tpu.dma_semaphore, #tpu.memory_space<semaphore_mem>>
    %119 = tpu.memref_squeeze %118 : memref<1x!tpu.dma_semaphore, #tpu.memory_space<semaphore_mem>> -> memref<!tpu.dma_semaphore, #tpu.memory_space<semaphore_mem>>
    tpu.wait_dma2 semaphore(%119 : memref<!tpu.dma_semaphore, #tpu.memory_space<semaphore_mem>>) src(%arg13 : memref<1024x256xbf16, #tpu.memory_space<any>>) dst(%arg17 : memref<1024x256xbf16, #tpu.memory_space<vmem>>)
    %120 = arith.truncf %117 : vector<8x1024xf32> to vector<8x1024xbf16>
    %c0_51 = arith.constant 0 : index
    %c0_52 = arith.constant 0 : index
    %121 = vector.load %arg17[%c0_51, %c0_52] : memref<1024x256xbf16, #tpu.memory_space<vmem>>, vector<1024x256xbf16>
    %cst_53 = arith.constant dense<0.000000e+00> : vector<8x256xf32>
    %122 = tpu.matmul %120, %121, %cst_53 {dimension_numbers = #tpu.dot_dimension_numbers<[1], [0], [0], [1], [0, 0, 1, 1], [], []>} : vector<8x1024xbf16>, vector<1024x256xbf16>, vector<8x256xf32> -> vector<8x256xf32>
    %c0_54 = arith.constant 0 : index
    %c0_55 = arith.constant 0 : index
    %123 = vector.load %arg14[%c0_54, %c0_55] : memref<1x256xf32, #tpu.memory_space<vmem>>, vector<1x256xf32>
    %124 = vector.broadcast %123 : vector<1x256xf32> to vector<8x256xf32>
    %125 = arith.addf %122, %124 : vector<8x256xf32>
    %126 = math.tanh %125 : vector<8x256xf32>
    %c0_56 = arith.constant 0 : index
    %c0_57 = arith.constant 0 : index
    %127 = vector.load %arg15[%c0_56, %c0_57] : memref<8x256xf32, #tpu.memory_space<vmem>>, vector<8x256xf32>
    tpu.vector_store %arg15[%c0_56, %c0_57], %126 {strides = array<i32>} : memref<8x256xf32, #tpu.memory_space<vmem>>, vector<8x256xf32>,
    return
  }
  func.func @transform_0(%arg0: i32) -> (i32, i32) {
    %c0_i32 = arith.constant 0 : i32
    %c0_i32_0 = arith.constant 0 : i32
    %c0_i32_1 = arith.constant 0 : i32
    return %c0_i32, %c0_i32_0 : i32, i32
  }
  func.func @transform_1(%arg0: i32) -> (i32, i32) {
    %c0_i32 = arith.constant 0 : i32
    %c0_i32_0 = arith.constant 0 : i32
    %c0_i32_1 = arith.constant 0 : i32
    return %c0_i32, %c0_i32_0 : i32, i32
  }
  func.func @transform_2(%arg0: i32) -> (i32, i32) {
    %c0_i32 = arith.constant 0 : i32
    %c0_i32_0 = arith.constant 0 : i32
    %c0_i32_1 = arith.constant 0 : i32
    return %c0_i32, %c0_i32_0 : i32, i32
  }
  func.func @transform_3(%arg0: i32) -> (i32, i32) {
    %c0_i32 = arith.constant 0 : i32
    %c0_i32_0 = arith.constant 0 : i32
    %c0_i32_1 = arith.constant 0 : i32
    return %c0_i32, %c0_i32_0 : i32, i32
  }
  func.func @transform_4(%arg0: i32) -> (i32, i32) {
    %c0_i32 = arith.constant 0 : i32
    %c0_i32_0 = arith.constant 0 : i32
    %c0_i32_1 = arith.constant 0 : i32
    return %c0_i32, %c0_i32_0 : i32, i32
  }
  func.func @transform_5(%arg0: i32) -> (i32, i32) {
    %c0_i32 = arith.constant 0 : i32
    %c0_i32_0 = arith.constant 0 : i32
    %c0_i32_1 = arith.constant 0 : i32
    return %c0_i32, %c0_i32_0 : i32, i32
  }
  func.func @transform_6(%arg0: i32) -> (i32, i32) {
    %c0_i32 = arith.constant 0 : i32
    %c0_i32_0 = arith.constant 0 : i32
    %c0_i32_1 = arith.constant 0 : i32
    return %c0_i32, %c0_i32_0 : i32, i32
  }
  func.func @transform_7(%arg0: i32) -> (i32, i32) {
    %c0_i32 = arith.constant 0 : i32
    %c0_i32_0 = arith.constant 0 : i32
    %c0_i32_1 = arith.constant 0 : i32
    return %c0_i32, %c0_i32_0 : i32, i32
  }
  func.func @transform_8(%arg0: i32) -> (i32, i32) {
    %c0_i32 = arith.constant 0 : i32
    %c0_i32_0 = arith.constant 0 : i32
    %c0_i32_1 = arith.constant 0 : i32
    return %c0_i32, %c0_i32_0 : i32, i32
  }
  func.func @transform_10(%arg0: i32) -> (i32, i32) {
    %c0_i32 = arith.constant 0 : i32
    %c0_i32_0 = arith.constant 0 : i32
    %c0_i32_1 = arith.constant 0 : i32
    return %c0_i32, %c0_i32_0 : i32, i32
  }
  func.func @transform_11(%arg0: i32) -> (i32, i32) {
    %c0_i32 = arith.constant 0 : i32
    %c0_i32_0 = arith.constant 0 : i32
    %c0_i32_1 = arith.constant 0 : i32
    return %c0_i32, %c0_i32_0 : i32, i32
  }
  func.func @transform_13(%arg0: i32) -> (i32, i32) {
    %c0_i32 = arith.constant 0 : i32
    %c0_i32_0 = arith.constant 0 : i32
    %c0_i32_1 = arith.constant 0 : i32
    return %c0_i32, %c0_i32_0 : i32, i32
  }
  func.func @transform_14(%arg0: i32) -> (i32, i32) {
    %c0_i32 = arith.constant 0 : i32
    %c0_i32_0 = arith.constant 0 : i32
    %c0_i32_1 = arith.constant 0 : i32
    return %c0_i32, %c0_i32_0 : i32, i32
  }
}

</mosaic_0001>

<bundles_post_ra>
// kernel: generator2_forward.1
= control target key start
LH: loop header
LB: loop body
LE: loop exit
PB: predicated region body
PF: predicated region fallthrough
CT: control target
= control target key end

     0   :  { %19 = vsyncpa [#allocation6], 0  ;;  %s3573_s0 = inlined_call_operand.vmem [shape: bf16[8,768], index: 0, kind: input, shape index: {}]   ;;  %s3574_s1 = inlined_call_operand.vmem [shape: f32[8,128], index: 1, kind: input, shape index: {}]   ;;  %s3575_s2 = inlined_call_operand.hbm [shape: bf16[768,128], index: 2, kind: input, shape index: {}]   ;;  %s3576_s3 = inlined_call_operand.vmem [shape: bf16[128,256], index: 3, kind: input, shape index: {}]   ;;  %s3577_s4 = inlined_call_operand.vmem [shape: f32[1,256], index: 4, kind: input, shape index: {}]   ;;  %s3578_s5 = inlined_call_operand.vmem [shape: f32[1,256], index: 5, kind: input, shape index: {}]   ;;  %s3579_s6 = inlined_call_operand.hbm [shape: bf16[256,512], index: 6, kind: input, shape index: {}]   ;;  %s3580_s7 = inlined_call_operand.vmem [shape: f32[1,512], index: 7, kind: input, shape index: {}]   ;;  %s3581_s8 = inlined_call_operand.vmem [shape: f32[1,512], index: 8, kind: input, shape index: {}]   ;;  %s3582_s9 = inlined_call_operand.hbm [shape: bf16[512,1024], index: 9, kind: input, shape index: {}]   ;;  %s3583_s10 = inlined_call_operand.vmem [shape: f32[1,1024], index: 10, kind: input, shape index: {}]   ;;  %s3584_s11 = inlined_call_operand.vmem [shape: f32[1,1024], index: 11, kind: input, shape index: {}]   ;;  %s3585_s12 = inlined_call_operand.hbm [shape: bf16[1024,256], index: 12, kind: input, shape index: {}]   ;;  %s3586_s13 = inlined_call_operand.vmem [shape: f32[1,256], index: 13, kind: input, shape index: {}]   ;;  %s3587_s14 = inlined_call_operand.vmem [shape: f32[8,256], index: 14, kind: output, shape index: {}]  }
   0x1   :  { %20 = vsyncpa [#allocation8], 0  ;;  %s3210_s29 = smov [#allocation5]   ;;  %s3158_s17 = scalar_lea.hbm %s3575_s2, 6144 }
   0x2   :  { %s30_s30 = sshll.u32 %s3210_s29, 4  ;;  %p3159_p0 = scmp.ne.s32.totalorder %s3575_s2, %s3158_s17  ;;  %s31_s30 = int_to_ptr.vmem [resolvable:$true] %s30_s30 }
   0x3   :  { %p3162_p1 = scmp.lt.u32.totalorder %s3158_s17, %s3575_s2 }
   0x5   :  { %p3164_p2 = pnand %p3162_p1, %p3159_p0 }
   0x7   :  { %3167 = shalt.err (!%p3164_p2)
}
   0x8   :  { %s3168_s22 = scalar_lea.vmem %s31_s30, 6144  ;;  %p3173_p4 = scmp.lt.s32.totalorder %s31_s30, %s31_s30 }
   0x9   :  { %p3169_p3 = scmp.ne.s32.totalorder %s31_s30, %s3168_s22  ;;  %p3174_p5 = scmp.lt.s32.totalorder %s3168_s22, %s3168_s22 }
   0xb   :  { %p3175_p6 = por %p3174_p5, %p3173_p4 }
   0xd   :  { %p3176_p7 = pnand %p3175_p6, %p3169_p3 }
   0xf   :  { %3179 = shalt.err (!%p3176_p7)
}
  0x10   :  { %s3211_s23 = smov 64   ;;  %s3212_s24 = smov 4  }
  0x11   :  { %36 = dma.hbm_to_vmem [thread:$0]  %s3575_s2, 6144, %s31_s30, [#allocation6], %s3211_s23, %s3211_s23, %s3212_s24  }
  0x12   :  { %s3213_s27 = smov [#allocation7]   ;;  %s3180_s16 = scalar_lea.hbm %s3579_s6, 8192 }
  0x13   :  { %s48_s28 = sshll.u32 %s3213_s27, 4  ;;  %p3181_p8 = scmp.ne.s32.totalorder %s3579_s6, %s3180_s16  ;;  %s49_s28 = int_to_ptr.vmem [resolvable:$true] %s48_s28 }
  0x14   :  { %p3184_p9 = scmp.lt.u32.totalorder %s3180_s16, %s3579_s6 }
  0x16   :  { %p3186_p10 = pnand %p3184_p9, %p3181_p8 }
  0x18   :  { %3189 = shalt.err (!%p3186_p10)
}
  0x19   :  { %s3190_s21 = scalar_lea.vmem %s49_s28, 8192  ;;  %p3195_p12 = scmp.lt.s32.totalorder %s49_s28, %s49_s28 }
  0x1a   :  { %p3191_p11 = scmp.ne.s32.totalorder %s49_s28, %s3190_s21  ;;  %p3196_p13 = scmp.lt.s32.totalorder %s3190_s21, %s3190_s21 }
  0x1c   :  { %p3197_p0 = por %p3196_p13, %p3195_p12 }
  0x1e   :  { %p3198_p1 = pnand %p3197_p0, %p3191_p11 }
  0x20   :  { %3201 = shalt.err (!%p3198_p1)
}
  0x21   :  { %s3214_s2 = smov 256   ;;  %s3215_s30 = smov 16  }
  0x22   :  { %54 = dma.hbm_to_vmem [thread:$0]  %s3579_s6, 8192, %s49_s28, [#allocation8], %s3214_s2, %s3214_s2, %s3215_s30  }
  0x23   :  { %3202 = dma.done.wait [#allocation6], 6144  }
  0x24   :  { %3203 = vsyncadd [#allocation6], 4294961152 }
  0x25   :  { %3204 = dma.done.wait [#allocation8], 8192  }
  0x26   :  { %3205 = vsyncadd [#allocation8], 4294959104  ;;  %s76_s26 = sld [smem:[#allocation0]]   ;;  %s3216_s27 = smov 1024  }
  0x27   :  { %88 = sst [smem:[#allocation10]] %s3216_s27  ;;  %s3217_s29 = smov 8  }
  0x28   :  { %90 = sst [smem:[#allocation10 + $0x1]] %s3216_s27  ;;  %s3218_s15 = smov [#allocation2]  }
  0x29   :  { %92 = sst [smem:[#allocation10 + $0x2]] %s3217_s29  ;;  %s84_s16 = sshll.u32 %s3218_s15, 4  ;;  %s85_s16 = int_to_ptr.vmem [resolvable:$true] %s84_s16 }
  0x2a   :  { %94 = sst [smem:[#allocation10 + $0x3]] %s3211_s23  ;;  %s3219_s17 = smov 512  }
  0x2b   :  { %100 = sst [smem:[#allocation10 + $0x6]] %s3219_s17  ;;  %s3220_s18 = smov 128  }
  0x2c   :  { %102 = sst [smem:[#allocation10 + $0x7]] %s3211_s23  ;;  %s2700_s6 = sshll.u32 %s76_s26, 26 }
  0x2d   :  { %104 = sst [smem:[#allocation10 + $0x8]] %s3212_s24  ;;  %s2701_s28 = sadd.s32 134217728, %s2700_s6 }
  0x2e   :  { %96 = sst [smem:[#allocation10 + $0x4]] %s3220_s18  ;;  %s3221_s19 = smov 2  }
  0x2f   :  { %98 = sst [smem:[#allocation10 + $0x5]] %s3221_s19  ;;  %s3222_s20 = smov [#allocation4]  }
  0x30   :  { %s3223_s21 = smov [#allocation9]   ;;  %s3224_s25 = smov [#allocation3]  }
  0x31   :  { %106 = dma.general %s3582_s9, 32768, %s85_s16, %s3222_s20, %s3223_s21, [#allocation10], %s2701_s28, 0  }
  0x32   :  { %123 = sst [smem:[#allocation12]] %s3214_s2  ;;  %s119_s27 = sshll.u32 %s3224_s25, 4  ;;  %s120_s27 = int_to_ptr.vmem [resolvable:$true] %s119_s27 }
  0x33   :  { %125 = sst [smem:[#allocation12 + $0x1]] %s3214_s2  ;;  %s3225_s26 = smov [#allocation4 + $0x1]  }
  0x34   :  { %127 = sst [smem:[#allocation12 + $0x2]] %s3221_s19  ;;  %s3226_s29 = smov [#allocation11]  }
  0x35   :  { %129 = sst [smem:[#allocation12 + $0x3]] %s3211_s23 }
  0x36   :  { %131 = sst [smem:[#allocation12 + $0x4]] %s3220_s18 }
  0x37   :  { %133 = sst [smem:[#allocation12 + $0x5]] %s3221_s19 }
  0x38   :  { %135 = sst [smem:[#allocation12 + $0x6]] %s3220_s18 }
  0x39   :  { %137 = sst [smem:[#allocation12 + $0x7]] %s3211_s23 }
  0x3a   :  { %139 = sst [smem:[#allocation12 + $0x8]] %s3212_s24 }
  0x3b   :  { %141 = dma.general %s3585_s12, 16384, %s120_s27, %s3225_s26, %s3226_s29, [#allocation12], %s2701_s28, 0  }
  0x3c   :  { %v2952_v0 = vld [vmem:[#allocation5 + $0x40] sm:$0xff]   ;;  %v2956_v4 = vld [vmem:[#allocation5 + $0x48] sm:$0xff]   ;;  %v2960_v8 = vld [vmem:[#allocation5 + $0x50] sm:$0xff]  }
  0x3d   :  { %v2953_v1 = vld [vmem:[#allocation5] sm:$0xff]   ;;  %2840 = vmatprep.subr.bf16.mxu0 %v2952_v0  ;;  %v2957_v5 = vld [vmem:[#allocation5 + $0x8] sm:$0xff]   ;;  %v2961_v9 = vld [vmem:[#allocation5 + $0x10] sm:$0xff]  }
  0x3e   :  { %v2954_v2 = vld [vmem:[#allocation5 + $0xc0] sm:$0xff]   ;;  %2841 = vmatpush3.bf16.msra.mxu0 %v2953_v1  ;;  %v2958_v6 = vld [vmem:[#allocation5 + $0xc8] sm:$0xff]   ;;  %v2962_v10 = vld [vmem:[#allocation5 + $0xd0] sm:$0xff]  }
  0x3f   :  { %v2955_v3 = vld [vmem:[#allocation5 + $0x80] sm:$0xff]   ;;  %2862 = vmatprep.subr.bf16.mxu1 %v2954_v2  ;;  %2842 = vmatprep.subr.bf16.mxu0 %v2956_v4  ;;  %v2959_v7 = vld [vmem:[#allocation5 + $0x88] sm:$0xff]   ;;  %v2963_v11 = vld [vmem:[#allocation5 + $0x90] sm:$0xff]  }
  0x40   :  { %2863 = vmatpush3.bf16.msra.mxu1 %v2955_v3  ;;  %v2964_v12 = vld [vmem:[#allocation5 + $0x58] sm:$0xff]   ;;  %v2968_v16 = vld [vmem:[#allocation5 + $0x60] sm:$0xff]   ;;  %v2972_v20 = vld [vmem:[#allocation5 + $0x68] sm:$0xff]  }
  0x41   :  { %2864 = vmatprep.subr.bf16.mxu1 %v2958_v6  ;;  %v2965_v13 = vld [vmem:[#allocation5 + $0x18] sm:$0xff]   ;;  %v2969_v17 = vld [vmem:[#allocation5 + $0x20] sm:$0xff]   ;;  %v2973_v21 = vld [vmem:[#allocation5 + $0x28] sm:$0xff]  }
  0x42   :  { %2843 = vmatpush3.bf16.msra.mxu0 %v2957_v5  ;;  %v2966_v14 = vld [vmem:[#allocation5 + $0xd8] sm:$0xff]   ;;  %v2970_v18 = vld [vmem:[#allocation5 + $0xe0] sm:$0xff]   ;;  %v2974_v22 = vld [vmem:[#allocation5 + $0xe8] sm:$0xff]  }
  0x43   :  { %2844 = vmatprep.subr.bf16.mxu0 %v2960_v8  ;;  %v2967_v15 = vld [vmem:[#allocation5 + $0x98] sm:$0xff]   ;;  %v2971_v19 = vld [vmem:[#allocation5 + $0xa0] sm:$0xff]   ;;  %v2975_v23 = vld [vmem:[#allocation5 + $0xa8] sm:$0xff]  }
  0x44   :  { %2865 = vmatpush3.bf16.msra.mxu1 %v2959_v7  ;;  %v2976_v24 = vld [vmem:[#allocation5 + $0x70] sm:$0xff]   ;;  %v2980_v28 = vld [vmem:[#allocation5 + $0x78] sm:$0xff]   ;;  %v142_v31 = vld [vmem:[%s3573_s0] sm:$0xff] }
  0x45   :  { %2866 = vmatprep.subr.bf16.mxu1 %v2962_v10  ;;  %v2977_v25 = vld [vmem:[#allocation5 + $0x30] sm:$0xff]   ;;  %v2981_v29 = vld [vmem:[#allocation5 + $0x38] sm:$0xff]   ;;  %v2704_v32 = vcombine.low %v142_v31, %v142_v31  ;;  %v2705_v33 = vcombine.high %v142_v31, %v142_v31  ;;  %v2986_v35 = vld [vmem:[#allocation5 + $0x140] sm:$0xff]  }
  0x46   :  { %2845 = vmatpush3.bf16.msra.mxu0 %v2961_v9  ;;  %v2978_v26 = vld [vmem:[#allocation5 + $0xf0] sm:$0xff]   ;;  %v2982_v30 = vld [vmem:[#allocation5 + $0xf8] sm:$0xff]   ;;  %v143_v36 = vld [vmem:[%s3573_s0 + $0x8] sm:$0xff]  ;;  %v3227_v9 = vmov 0  }
  0x47   :  { %2846 = vmatprep.subr.bf16.mxu0 %v2964_v12  ;;  %v2979_v27 = vld [vmem:[#allocation5 + $0xb0] sm:$0xff]   ;;  %v2985_v34 = vld [vmem:[#allocation5 + $0xb8] sm:$0xff]   ;;  %583 = vmatprep.mubr.bf16.mxu0 %v2705_v33  ;;  %v2706_v37 = vcombine.low %v143_v36, %v143_v36  ;;  %v2707_v38 = vcombine.high %v143_v36, %v143_v36  ;;  %v2989_v39 = vld [vmem:[#allocation5 + $0x100] sm:$0xff]  }
  0x48   :  { %2867 = vmatpush3.bf16.msra.mxu1 %v2963_v11  ;;  %v2990_v40 = vld [vmem:[#allocation5 + $0x148] sm:$0xff]   ;;  %v2992_v42 = vld [vmem:[#allocation5 + $0x150] sm:$0xff]   ;;  %v2994_v44 = vld [vmem:[#allocation5 + $0x158] sm:$0xff]  }
  0x49   :  { %2868 = vmatprep.subr.bf16.mxu1 %v2966_v14  ;;  %623 = vmatprep.mubr.bf16.mxu1 %v2707_v38  ;;  %v2991_v41 = vld [vmem:[#allocation5 + $0x108] sm:$0xff]   ;;  %v2993_v43 = vld [vmem:[#allocation5 + $0x110] sm:$0xff]   ;;  %v2995_v45 = vld [vmem:[#allocation5 + $0x118] sm:$0xff]  }
  0x4a   :  { %2847 = vmatpush3.bf16.msra.mxu0 %v2965_v13  ;;  %v2996_v46 = vld [vmem:[#allocation5 + $0x160] sm:$0xff]   ;;  %v2998_v48 = vld [vmem:[#allocation5 + $0x168] sm:$0xff]   ;;  %v144_v49 = vld [vmem:[%s3573_s0 + $0x10] sm:$0xff] }
  0x4b   :  { %2848 = vmatprep.subr.bf16.mxu0 %v2968_v16  ;;  %v2997_v47 = vld [vmem:[#allocation5 + $0x120] sm:$0xff]   ;;  %v2709_v50 = vcombine.high %v144_v49, %v144_v49  ;;  %v2999_v51 = vld [vmem:[#allocation5 + $0x128] sm:$0xff]   ;;  %v3000_v52 = vld [vmem:[#allocation5 + $0x170] sm:$0xff]   ;;  %v2708_v56 = vcombine.low %v144_v49, %v144_v49 }
  0x4c   :  { %2869 = vmatpush3.bf16.msra.mxu1 %v2967_v15  ;;  %v3001_v53 = vld [vmem:[#allocation5 + $0x130] sm:$0xff]   ;;  %v3002_v54 = vld [vmem:[#allocation5 + $0x178] sm:$0xff]   ;;  %v3006_v57 = vld [vmem:[%s3576_s3] ss:$8 sps:$4 sm:$0xff]  }
  0x4d   :  { %2870 = vmatprep.subr.bf16.mxu1 %v2970_v18  ;;  %v3003_v55 = vld [vmem:[#allocation5 + $0x138] sm:$0xff]   ;;  %v3008_v58 = vld [vmem:[%s3576_s3 + $0x4] ss:$8 sps:$4 sm:$0xff]   ;;  %v3012_v62 = vld [vmem:[%s3576_s3 + $0x20] ss:$8 sps:$4 sm:$0xff]  }
  0x4e   :  { %2849 = vmatpush3.bf16.msra.mxu0 %v2969_v17  ;;  %v3011_v59 = vld [vmem:[%s3576_s3 + $0x14] ss:$8 sps:$4 sm:$0xff]   ;;  %v3009_v60 = vld [vmem:[%s3576_s3 + $0x10] ss:$8 sps:$4 sm:$0xff]   ;;  %v3014_v61 = vld [vmem:[%s3576_s3 + $0x24] ss:$8 sps:$4 sm:$0xff]  }
  0x4f   :  { %2850 = vmatprep.subr.bf16.mxu0 %v2972_v20  ;;  %v3017_v63 = vld [vmem:[%s3576_s3 + $0x34] ss:$8 sps:$4 sm:$0xff]   ;;  %v3015_v0 = vld [vmem:[%s3576_s3 + $0x30] ss:$8 sps:$4 sm:$0xff]   ;;  %v3020_v1 = vld [vmem:[%s3576_s3 + $0x44] ss:$8 sps:$4 sm:$0xff]  }
  0x50   :  { %2871 = vmatpush3.bf16.msra.mxu1 %v2971_v19  ;;  %v3018_v2 = vld [vmem:[%s3576_s3 + $0x40] ss:$8 sps:$4 sm:$0xff]   ;;  %v3023_v3 = vld [vmem:[%s3576_s3 + $0x54] ss:$8 sps:$4 sm:$0xff]   ;;  %v3021_v4 = vld [vmem:[%s3576_s3 + $0x50] ss:$8 sps:$4 sm:$0xff]  }
  0x51   :  { %2872 = vmatprep.subr.bf16.mxu1 %v2974_v22  ;;  %v3026_v5 = vld [vmem:[%s3576_s3 + $0x64] ss:$8 sps:$4 sm:$0xff]   ;;  %v3024_v6 = vld [vmem:[%s3576_s3 + $0x60] ss:$8 sps:$4 sm:$0xff]   ;;  %v3029_v7 = vld [vmem:[%s3576_s3 + $0x74] ss:$8 sps:$4 sm:$0xff]  }
  0x52   :  { %2851 = vmatpush3.bf16.msra.mxu0 %v2973_v21  ;;  %v3027_v8 = vld [vmem:[%s3576_s3 + $0x70] ss:$8 sps:$4 sm:$0xff]   ;;  %v3032_v10 = vld [vmem:[#allocation7 + $0x4] ss:$16 sps:$4 sm:$0xff]  }
  0x53   :  { %2852 = vmatprep.subr.bf16.mxu0 %v2976_v24  ;;  %v241_v12 = vld [vmem:[%s3574_s1] sm:$0xff] }
  0x54   :  { %2873 = vmatpush3.bf16.msra.mxu1 %v2975_v23  ;;  %v3038_v36 = vld [vmem:[#allocation7 + $0x44] ss:$16 sps:$4 sm:$0xff]   ;;  %v3054_v49 = vld [vmem:[#allocation7 + $0x100] ss:$16 sps:$4 sm:$0xff]  }
  0x55   :  { %2874 = vmatprep.subr.bf16.mxu1 %v2978_v26  ;;  %v3041_v38 = vld [vmem:[#allocation7 + $0x64] ss:$16 sps:$4 sm:$0xff]  }
  0x56   :  { %2853 = vmatpush3.bf16.msra.mxu0 %v2977_v25 }
  0x57   :  { %2854 = vmatprep.subr.bf16.mxu0 %v2980_v28 }
  0x58   :  { %2875 = vmatpush3.bf16.msra.mxu1 %v2979_v27 }
  0x59   :  { %2876 = vmatprep.subr.bf16.mxu1 %v2982_v30 }
  0x5a   :  { %2855 = vmatpush3.bf16.msra.mxu0 %v2981_v29 }
  0x5b   :  { %2884 = vmatprep.subr.bf16.mxu0 %v2986_v35  ;;  %v3033_v35 = vld [vmem:[#allocation7 + $0x20] ss:$16 sps:$4 sm:$0xff]  }
  0x5c   :  { %2877 = vmatpush3.bf16.msra.mxu1 %v2985_v34  ;;  %v3035_v34 = vld [vmem:[#allocation7 + $0x24] ss:$16 sps:$4 sm:$0xff]  }
  0x5d   :  { %584 = vmatmul.mubr.bf16.vlgmr.msra.gmra.mrb[0].mxu0 %v2704_v32  ;;  %771 = vmatprep.subr.bf16.mxu1 %v3008_v58  ;;  %v3030_v32 = vld [vmem:[#allocation7] ss:$16 sps:$4 sm:$0xff]   ;;  %v3071_v58 = vld [vmem:[#allocation7 + $0x1a4] ss:$16 sps:$4 sm:$0xff]  }
  0x5e   :  { %2885 = vmatpush3.bf16.msra.mxu0 %v2989_v39  ;;  %663 = vmatprep.mubr.bf16.mxu0 %v2709_v50  ;;  %v3039_v39 = vld [vmem:[#allocation7 + $0x60] ss:$16 sps:$4 sm:$0xff]   ;;  %v3059_v50 = vld [vmem:[#allocation7 + $0x124] ss:$16 sps:$4 sm:$0xff]  }
  0x5f   :  { %624 = vmatmul.mubr.bf16.vlgmr.msra.gmra.mrb[0].mxu1 %v2706_v37  ;;  %2886 = vmatprep.subr.bf16.mxu0 %v2990_v40  ;;  %v3036_v37 = vld [vmem:[#allocation7 + $0x40] ss:$16 sps:$4 sm:$0xff]   ;;  %v3044_v40 = vld [vmem:[#allocation7 + $0x84] ss:$16 sps:$4 sm:$0xff]  }
  0x60   :  { %772 = vmatpush1.bf16.msra.mxu1 %v3006_v57  ;;  %803 = vmatprep.mubr.bf16.mxu1 %v3227_v9  ;;  %v3066_v57 = vld [vmem:[#allocation7 + $0x180] ss:$16 sps:$4 sm:$0xff]  }
  0x61   :  { %773 = vmatprep.subr.bf16.mxu1 %v3011_v59  ;;  %v3069_v59 = vld [vmem:[#allocation7 + $0x1a0] ss:$16 sps:$4 sm:$0xff]  }
  0x62   :  { %2887 = vmatpush3.bf16.msra.mxu0 %v2991_v41  ;;  %v3042_v41 = vld [vmem:[#allocation7 + $0x80] ss:$16 sps:$4 sm:$0xff]  }
  0x63   :  { %2888 = vmatprep.subr.bf16.mxu0 %v2992_v42  ;;  %v3047_v42 = vld [vmem:[#allocation7 + $0xa4] ss:$16 sps:$4 sm:$0xff]  }
  0x64   :  { %774 = vmatpush1.bf16.msra.mxu1 %v3009_v60  ;;  %v3074_v60 = vld [vmem:[#allocation7 + $0x1c4] ss:$16 sps:$4 sm:$0xff]  }
  0x65   :  { %775 = vmatprep.subr.bf16.mxu1 %v3014_v61  ;;  %v3072_v61 = vld [vmem:[#allocation7 + $0x1c0] ss:$16 sps:$4 sm:$0xff]  }
  0x66   :  { %2889 = vmatpush3.bf16.msra.mxu0 %v2993_v43  ;;  %v3045_v43 = vld [vmem:[#allocation7 + $0xa0] ss:$16 sps:$4 sm:$0xff]  }
  0x67   :  { %2890 = vmatprep.subr.bf16.mxu0 %v2994_v44  ;;  %v3050_v44 = vld [vmem:[#allocation7 + $0xc4] ss:$16 sps:$4 sm:$0xff]  }
  0x68   :  { %776 = vmatpush1.bf16.msra.mxu1 %v3012_v62  ;;  %v3077_v62 = vld [vmem:[#allocation7 + $0x1e4] ss:$16 sps:$4 sm:$0xff]  }
  0x69   :  { %777 = vmatprep.subr.bf16.mxu1 %v3017_v63  ;;  %v3075_v63 = vld [vmem:[#allocation7 + $0x1e0] ss:$16 sps:$4 sm:$0xff]  }
  0x6a   :  { %2891 = vmatpush3.bf16.msra.mxu0 %v2995_v45  ;;  %v3048_v45 = vld [vmem:[#allocation7 + $0xc0] ss:$16 sps:$4 sm:$0xff]  }
  0x6b   :  { %2892 = vmatprep.subr.bf16.mxu0 %v2996_v46  ;;  %v3053_v46 = vld [vmem:[#allocation7 + $0xe4] ss:$16 sps:$4 sm:$0xff]  }
  0x6c   :  { %778 = vmatpush1.bf16.msra.mxu1 %v3015_v0  ;;  %v3080_v0 = vld [vmem:[#allocation7 + $0xc] ss:$16 sps:$4 sm:$0xff]  }
  0x6d   :  { %779 = vmatprep.subr.bf16.mxu1 %v3020_v1 }
  0x6e   :  { %2893 = vmatpush3.bf16.msra.mxu0 %v2997_v47  ;;  %v3051_v47 = vld [vmem:[#allocation7 + $0xe0] ss:$16 sps:$4 sm:$0xff]  }
  0x6f   :  { %2894 = vmatprep.subr.bf16.mxu0 %v2998_v48  ;;  %v3056_v48 = vld [vmem:[#allocation7 + $0x104] ss:$16 sps:$4 sm:$0xff]  }
  0x70   :  { %780 = vmatpush1.bf16.msra.mxu1 %v3018_v2 }
  0x71   :  { %781 = vmatprep.subr.bf16.mxu1 %v3023_v3 }
  0x72   :  { %2895 = vmatpush3.bf16.msra.mxu0 %v2999_v51  ;;  %v3057_v51 = vld [vmem:[#allocation7 + $0x120] ss:$16 sps:$4 sm:$0xff]  }
  0x73   :  { %2896 = vmatprep.subr.bf16.mxu0 %v3000_v52  ;;  %v3062_v52 = vld [vmem:[#allocation7 + $0x144] ss:$16 sps:$4 sm:$0xff]  }
  0x74   :  { %782 = vmatpush1.bf16.msra.mxu1 %v3021_v4 }
  0x75   :  { %783 = vmatprep.subr.bf16.mxu1 %v3026_v5 }
  0x76   :  { %2897 = vmatpush3.bf16.msra.mxu0 %v3001_v53  ;;  %v3060_v53 = vld [vmem:[#allocation7 + $0x140] ss:$16 sps:$4 sm:$0xff]  }
  0x77   :  { %2898 = vmatprep.subr.bf16.mxu0 %v3002_v54  ;;  %v3065_v54 = vld [vmem:[#allocation7 + $0x164] ss:$16 sps:$4 sm:$0xff]  }
  0x78   :  { %784 = vmatpush1.bf16.msra.mxu1 %v3024_v6 }
  0x79   :  { %785 = vmatprep.subr.bf16.mxu1 %v3029_v7 }
  0x7a   :  { %2899 = vmatpush3.bf16.msra.mxu0 %v3003_v55  ;;  %v3063_v55 = vld [vmem:[#allocation7 + $0x160] ss:$16 sps:$4 sm:$0xff]  }
  0x7c   :  { %786 = vmatpush1.bf16.msra.mxu1 %v3027_v8 }
  0x7d   :  { %664 = vmatmul.mubr.bf16.vlgmr.msra.gmra.mrb[4].mxu0 %v2708_v56  ;;  %1271 = vmatprep.subr.bf16.mxu1 %v3032_v10  ;;  %v3068_v56 = vld [vmem:[#allocation7 + $0x184] ss:$16 sps:$4 sm:$0xff]  }
 0x130   :  { %v2856_v11 = vpop.f32.mrb[0].mxu0 }
 0x131   :  { %v2857_v13 = vpop.f32.mrb[1].mxu0 }
 0x132   :  { %v2858_v14 = vadd.f32 %v2857_v13, %v2856_v11  ;;  %v2859_v15 = vpop.f32.mrb[2].mxu0  ;;  %v2878_v16 = vpop.f32.mrb[0].mxu1 }
 0x133   :  { %v2860_v17 = vpop.f32.mrb[3].mxu0  ;;  %v2879_v18 = vpop.f32.mrb[1].mxu1 }
 0x134   :  { %v586_v19 = vadd.f32 %v2858_v14, %v241_v12  ;;  %v2880_v20 = vadd.f32 %v2879_v18, %v2878_v16  ;;  %v2881_v21 = vpop.f32.mrb[2].mxu1 }
 0x135   :  { %v2882_v22 = vpop.f32.mrb[3].mxu1 }
 0x136   :  { %v626_v23 = vadd.f32 %v2880_v20, %v586_v19 }
 0x150   :  { %v2900_v24 = vpop.f32.mrb[4].mxu0 }
 0x151   :  { %v2901_v25 = vpop.f32.mrb[5].mxu0 }
 0x152   :  { %v2902_v26 = vadd.f32 %v2901_v25, %v2900_v24  ;;  %v2903_v27 = vpop.f32.mrb[6].mxu0 }
 0x153   :  { %v2904_v28 = vpop.f32.mrb[7].mxu0 }
 0x154   :  { %v666_v29 = vadd.f32 %v2902_v26, %v626_v23 }
 0x156   :  { %vm671_vm0 = vcmp.gt.f32.partialorder %v666_v29, 0.0  ;;  %v672_v30 = vmul.f32 0.2, %v666_v29 }
 0x158   :  { %v673_v31 = vsel %vm671_vm0, %v666_v29, %v672_v30 }
 0x159   :  { %v674_v33 = vpack.c.bf16 %v673_v31, %v673_v31 }
 0x15b   :  { %804 = vmatmul.mubr.bf16.vlgmr.msra.gmra.mrb[4].mxu1 %v674_v33 }
 0x15c   :  { %1272 = vmatpush1.bf16.msra.mxu1 %v3030_v32 }
 0x15d   :  { %1273 = vmatprep.subr.bf16.mxu1 %v3035_v34 }
 0x160   :  { %1274 = vmatpush1.bf16.msra.mxu1 %v3033_v35 }
 0x161   :  { %1275 = vmatprep.subr.bf16.mxu1 %v3038_v36  ;;  %v854_v36 = vlaneseq }
 0x164   :  { %1276 = vmatpush1.bf16.msra.mxu1 %v3036_v37 }
 0x165   :  { %1277 = vmatprep.subr.bf16.mxu1 %v3041_v38 }
 0x168   :  { %1278 = vmatpush1.bf16.msra.mxu1 %v3039_v39 }
 0x169   :  { %1279 = vmatprep.subr.bf16.mxu1 %v3044_v40  ;;  %v3406_v40 = vshrl.u32 %v854_v36, 7 }
 0x16c   :  { %1280 = vmatpush1.bf16.msra.mxu1 %v3042_v41  ;;  %v3409_v41 = vsub.s32 0, %v3406_v40 }
 0x16d   :  { %1281 = vmatprep.subr.bf16.mxu1 %v3047_v42  ;;  %v812_v42 = vld [vmem:[%s3577_s4] sm:$0x3] }
 0x170   :  { %1282 = vmatpush1.bf16.msra.mxu1 %v3045_v43  ;;  %v3415_v43 = vsub.s32 1, %v3406_v40 }
 0x171   :  { %1283 = vmatprep.subr.bf16.mxu1 %v3050_v44  ;;  %v813_v44 = vld [vmem:[%s3578_s5] sm:$0x3] }
 0x174   :  { %1284 = vmatpush1.bf16.msra.mxu1 %v3048_v45  ;;  %v857_v45 = vrot.slane %v812_v42, %v3409_v41 }
 0x175   :  { %1285 = vmatprep.subr.bf16.mxu1 %v3053_v46 }
 0x178   :  { %1286 = vmatpush1.bf16.msra.mxu1 %v3051_v47  ;;  %v861_v47 = vrot.slane %v812_v42, %v3415_v43 }
 0x179   :  { %1287 = vmatprep.subr.bf16.mxu1 %v3056_v48 }
 0x17c   :  { %1288 = vmatpush1.bf16.msra.mxu1 %v3054_v49 }
 0x17d   :  { %1289 = vmatprep.subr.bf16.mxu1 %v3059_v50  ;;  %v870_v50 = vrot.slane %v813_v44, %v3409_v41 }
 0x180   :  { %1290 = vmatpush1.bf16.msra.mxu1 %v3057_v51 }
 0x181   :  { %1291 = vmatprep.subr.bf16.mxu1 %v3062_v52  ;;  %v874_v52 = vrot.slane %v813_v44, %v3415_v43 }
 0x184   :  { %1292 = vmatpush1.bf16.msra.mxu1 %v3060_v53 }
 0x185   :  { %1293 = vmatprep.subr.bf16.mxu1 %v3065_v54 }
 0x188   :  { %1294 = vmatpush1.bf16.msra.mxu1 %v3063_v55 }
 0x189   :  { %1295 = vmatprep.subr.bf16.mxu1 %v3068_v56 }
 0x18c   :  { %1296 = vmatpush1.bf16.msra.mxu1 %v3066_v57 }
 0x18d   :  { %1297 = vmatprep.subr.bf16.mxu1 %v3071_v58 }
 0x190   :  { %1298 = vmatpush1.bf16.msra.mxu1 %v3069_v59 }
 0x191   :  { %1299 = vmatprep.subr.bf16.mxu1 %v3074_v60 }
 0x194   :  { %1300 = vmatpush1.bf16.msra.mxu1 %v3072_v61 }
 0x195   :  { %1301 = vmatprep.subr.bf16.mxu1 %v3077_v62  ;;  %v3078_v62 = vld [vmem:[#allocation7 + $0x8] ss:$16 sps:$4 sm:$0xff]  }
 0x198   :  { %1302 = vmatpush1.bf16.msra.mxu1 %v3075_v63 }
 0x199   :  { %1312 = vmatprep.subr.bf16.mxu1 %v3080_v0  ;;  %v3083_v0 = vld [vmem:[#allocation7 + $0x2c] ss:$16 sps:$4 sm:$0xff]  }
 0x22e   :  { %v805_v1 = vpop.f32.mrb[4].mxu1 }
 0x22f   :  { %v814_v2 = vrot.slane %v805_v1, 4  ;;  %v807_v3 = vpop.f32.mrb[5].mxu1 }
 0x230   :  { %v820_v4 = vrot.slane %v807_v3, 4  ;;  %v809_v5 = vpop.f32.mrb[6].mxu1 }
 0x231   :  { %v815_v6 = vadd.f32 %v814_v2, %v805_v1  ;;  %v810_v7 = vpop.f32.mrb[7].mxu1  ;;  %v3086_v2 = vld [vmem:[#allocation7 + $0x4c] ss:$16 sps:$4 sm:$0xff]   ;;  %v3087_v5 = vld [vmem:[#allocation7 + $0x68] ss:$16 sps:$4 sm:$0xff]  }
 0x232   :  { %v821_v8 = vadd.f32 %v820_v4, %v807_v3  ;;  %v3089_v4 = vld [vmem:[#allocation7 + $0x6c] ss:$16 sps:$4 sm:$0xff]   ;;  %v3090_v7 = vld [vmem:[#allocation7 + $0x88] ss:$16 sps:$4 sm:$0xff]  }
 0x233   :  { %v816_v9 = vrot.slane %v815_v6, 2 }
 0x234   :  { %v822_v10 = vrot.slane %v821_v8, 2 }
 0x235   :  { %v817_v11 = vadd.f32 %v816_v9, %v815_v6  ;;  %v3092_v6 = vld [vmem:[#allocation7 + $0x8c] ss:$16 sps:$4 sm:$0xff]   ;;  %v3093_v9 = vld [vmem:[#allocation7 + $0xa8] ss:$16 sps:$4 sm:$0xff]  }
 0x236   :  { %v823_v12 = vadd.f32 %v822_v10, %v821_v8  ;;  %v3095_v8 = vld [vmem:[#allocation7 + $0xac] ss:$16 sps:$4 sm:$0xff]  }
 0x237   :  { %v818_v13 = vrot.slane %v817_v11, 1  ;;  %v3098_v10 = vld [vmem:[#allocation7 + $0xcc] ss:$16 sps:$4 sm:$0xff]  }
 0x238   :  { %v824_v14 = vrot.slane %v823_v12, 1 }
 0x239   :  { %v819_v15 = vadd.f32 %v818_v13, %v817_v11  ;;  %v3096_v11 = vld [vmem:[#allocation7 + $0xc8] ss:$16 sps:$4 sm:$0xff]  }
 0x23a   :  { %v825_v16 = vadd.f32 %v824_v14, %v823_v12  ;;  %v3101_v12 = vld [vmem:[#allocation7 + $0xec] ss:$16 sps:$4 sm:$0xff]   ;;  %v3099_v13 = vld [vmem:[#allocation7 + $0xe8] ss:$16 sps:$4 sm:$0xff]  }
 0x23b   :  { %v827_v17 = vmul.f32 0.125, %v819_v15  ;;  %v3104_v14 = vld [vmem:[#allocation7 + $0x10c] ss:$16 sps:$4 sm:$0xff]   ;;  %v3102_v15 = vld [vmem:[#allocation7 + $0x108] ss:$16 sps:$4 sm:$0xff]  }
 0x23c   :  { %v828_v18 = vmul.f32 0.125, %v825_v16  ;;  %v3107_v16 = vld [vmem:[#allocation7 + $0x12c] ss:$16 sps:$4 sm:$0xff]  }
 0x23d   :  { %v829_v19 = vsub.f32 %v805_v1, %v827_v17  ;;  %v3081_v1 = vld [vmem:[#allocation7 + $0x28] ss:$16 sps:$4 sm:$0xff]  }
 0x23e   :  { %v830_v20 = vsub.f32 %v807_v3, %v828_v18  ;;  %v3084_v3 = vld [vmem:[#allocation7 + $0x48] ss:$16 sps:$4 sm:$0xff]   ;;  %v3110_v18 = vld [vmem:[#allocation7 + $0x14c] ss:$16 sps:$4 sm:$0xff]  }
 0x23f   :  { %v831_v21 = vmul.f32 %v829_v19, %v829_v19  ;;  %v3105_v17 = vld [vmem:[#allocation7 + $0x128] ss:$16 sps:$4 sm:$0xff]  }
 0x240   :  { %v832_v22 = vmul.f32 %v830_v20, %v830_v20 }
 0x241   :  { %v833_v23 = vrot.slane %v831_v21, 4 }
 0x242   :  { %v839_v24 = vrot.slane %v832_v22, 4 }
 0x243   :  { %v834_v25 = vadd.f32 %v833_v23, %v831_v21  ;;  %v3111_v21 = vld [vmem:[#allocation7 + $0x168] ss:$16 sps:$4 sm:$0xff]  }
 0x244   :  { %v840_v26 = vadd.f32 %v839_v24, %v832_v22  ;;  %v3116_v22 = vld [vmem:[#allocation7 + $0x18c] ss:$16 sps:$4 sm:$0xff]   ;;  %v3114_v23 = vld [vmem:[#allocation7 + $0x188] ss:$16 sps:$4 sm:$0xff]  }
 0x245   :  { %v835_v27 = vrot.slane %v834_v25, 2  ;;  %v3119_v24 = vld [vmem:[#allocation7 + $0x1ac] ss:$16 sps:$4 sm:$0xff]  }
 0x246   :  { %v841_v28 = vrot.slane %v840_v26, 2 }
 0x247   :  { %v836_v29 = vadd.f32 %v835_v27, %v834_v25  ;;  %v3117_v25 = vld [vmem:[#allocation7 + $0x1a8] ss:$16 sps:$4 sm:$0xff]  }
 0x248   :  { %v842_v30 = vadd.f32 %v841_v28, %v840_v26  ;;  %v3122_v26 = vld [vmem:[#allocation7 + $0x1cc] ss:$16 sps:$4 sm:$0xff]   ;;  %v3120_v27 = vld [vmem:[#allocation7 + $0x1c8] ss:$16 sps:$4 sm:$0xff]  }
 0x249   :  { %v837_v31 = vrot.slane %v836_v29, 1  ;;  %v3125_v28 = vld [vmem:[#allocation7 + $0x1ec] ss:$16 sps:$4 sm:$0xff]  }
 0x24a   :  { %v843_v32 = vrot.slane %v842_v30, 1 }
 0x24b   :  { %v838_v33 = vadd.f32 %v837_v31, %v836_v29  ;;  %v3123_v29 = vld [vmem:[#allocation7 + $0x1e8] ss:$16 sps:$4 sm:$0xff]  }
 0x24c   :  { %v844_v34 = vadd.f32 %v843_v32, %v842_v30 }
 0x24d   :  { %v845_v35 = vmul.f32 0.125, %v838_v33 }
 0x24e   :  { %v846_v37 = vmul.f32 0.125, %v844_v34 }
 0x24f   :  { %v847_v38 = vadd.f32 0.8, %v845_v35 }
 0x250   :  { %v848_v39 = vadd.f32 0.8, %v846_v37 }
 0x251   :  { %3126 = vrsqrt.f32 %v847_v38 }
 0x252   :  { %3128 = vrsqrt.f32 %v848_v39 }
 0x25b   :  { %v3127_v46 = vpop.eup %3126 }
 0x25c   :  { %v3129_v48 = vpop.eup %3128  ;;  %v851_v49 = vmul.f32 %v3127_v46, %v829_v19  ;;  %v3108_v19 = vld [vmem:[#allocation7 + $0x148] ss:$16 sps:$4 sm:$0xff]  }
 0x25d   :  { %v852_v51 = vmul.f32 %v3129_v48, %v830_v20  ;;  %v3113_v20 = vld [vmem:[#allocation7 + $0x16c] ss:$16 sps:$4 sm:$0xff]  }
 0x25e   :  { %v864_v53 = vmul.f32 %v857_v45, %v851_v49 }
 0x25f   :  { %v865_v54 = vmul.f32 %v861_v47, %v852_v51 }
 0x260   :  { %v877_v55 = vadd.f32 %v870_v50, %v864_v53 }
 0x261   :  { %v878_v56 = vadd.f32 %v874_v52, %v865_v54 }
 0x262   :  { %vm879_vm1 = vcmp.gt.f32.partialorder %v877_v55, 0.0  ;;  %v881_v57 = vmul.f32 0.2, %v877_v55 }
 0x263   :  { %vm880_vm2 = vcmp.gt.f32.partialorder %v878_v56, 0.0  ;;  %v882_v58 = vmul.f32 0.2, %v878_v56 }
 0x264   :  { %v883_v59 = vsel %vm879_vm1, %v877_v55, %v881_v57 }
 0x265   :  { %v884_v60 = vsel %vm880_vm2, %v878_v56, %v882_v58  ;;  %v3424_v63 = vpack.c.bf16 %v883_v59, %v883_v59 }
 0x266   :  { %v886_v61 = vpack.c.bf16 %v884_v60, %v884_v60 }
 0x268   :  { %1303 = vmatprep.mubr.bf16.mxu1 %v886_v61 }
 0x269   :  { %1304 = vmatmul.mubr.bf16.vlgmr.msra.gmra.mrb[8].mxu1 %v3424_v63 }
 0x26a   :  { %1313 = vmatpush1.bf16.msra.mxu1 %v3078_v62  ;;  %1344 = vmatprep.mubr.bf16.mxu1 %v886_v61 }
 0x26b   :  { %1314 = vmatprep.subr.bf16.mxu1 %v3083_v0 }
 0x26e   :  { %1315 = vmatpush1.bf16.msra.mxu1 %v3081_v1 }
 0x26f   :  { %1316 = vmatprep.subr.bf16.mxu1 %v3086_v2 }
 0x272   :  { %1317 = vmatpush1.bf16.msra.mxu1 %v3084_v3 }
 0x273   :  { %1318 = vmatprep.subr.bf16.mxu1 %v3089_v4 }
 0x276   :  { %1319 = vmatpush1.bf16.msra.mxu1 %v3087_v5 }
 0x277   :  { %1320 = vmatprep.subr.bf16.mxu1 %v3092_v6 }
 0x27a   :  { %1321 = vmatpush1.bf16.msra.mxu1 %v3090_v7  ;;  %v3431_v7 = vld [vmem:[%s3580_s7] sm:$0xf] }
 0x27b   :  { %1322 = vmatprep.subr.bf16.mxu1 %v3095_v8  ;;  %v3436_v8 = vld [vmem:[%s3581_s8] sm:$0xf] }
 0x27e   :  { %1323 = vmatpush1.bf16.msra.mxu1 %v3093_v9  ;;  %v1435_v9 = vrot.slane %v3431_v7, %v3409_v41 }
 0x27f   :  { %1324 = vmatprep.subr.bf16.mxu1 %v3098_v10 }
 0x282   :  { %1325 = vmatpush1.bf16.msra.mxu1 %v3096_v11  ;;  %v1439_v11 = vrot.slane %v3431_v7, %v3415_v43 }
 0x283   :  { %1326 = vmatprep.subr.bf16.mxu1 %v3101_v12 }
 0x286   :  { %1327 = vmatpush1.bf16.msra.mxu1 %v3099_v13 }
 0x287   :  { %1328 = vmatprep.subr.bf16.mxu1 %v3104_v14  ;;  %v1460_v14 = vrot.slane %v3436_v8, %v3409_v41 }
 0x28a   :  { %1329 = vmatpush1.bf16.msra.mxu1 %v3102_v15 }
 0x28b   :  { %1330 = vmatprep.subr.bf16.mxu1 %v3107_v16  ;;  %v1464_v16 = vrot.slane %v3436_v8, %v3415_v43 }
 0x28e   :  { %1331 = vmatpush1.bf16.msra.mxu1 %v3105_v17 }
 0x28f   :  { %1332 = vmatprep.subr.bf16.mxu1 %v3110_v18 }
 0x292   :  { %1333 = vmatpush1.bf16.msra.mxu1 %v3108_v19 }
 0x293   :  { %1334 = vmatprep.subr.bf16.mxu1 %v3113_v20 }
 0x296   :  { %1335 = vmatpush1.bf16.msra.mxu1 %v3111_v21 }
 0x297   :  { %1336 = vmatprep.subr.bf16.mxu1 %v3116_v22 }
 0x29a   :  { %1337 = vmatpush1.bf16.msra.mxu1 %v3114_v23 }
 0x29b   :  { %1338 = vmatprep.subr.bf16.mxu1 %v3119_v24 }
 0x29e   :  { %1339 = vmatpush1.bf16.msra.mxu1 %v3117_v25 }
 0x29f   :  { %1340 = vmatprep.subr.bf16.mxu1 %v3122_v26 }
 0x2a2   :  { %1341 = vmatpush1.bf16.msra.mxu1 %v3120_v27 }
 0x2a3   :  { %1342 = vmatprep.subr.bf16.mxu1 %v3125_v28 }
 0x2a6   :  { %1343 = vmatpush1.bf16.msra.mxu1 %v3123_v29 }
 0x2a9   :  { %1345 = vmatmul.mubr.bf16.vlgmr.msra.gmra.mrb[12].mxu1 %v3424_v63 }
 0x33c   :  { %v1305_v30 = vpop.f32.mrb[8].mxu1 }
 0x33d   :  { %v1355_v31 = vrot.slane %v1305_v30, 4  ;;  %v1307_v32 = vpop.f32.mrb[9].mxu1 }
 0x33e   :  { %v1361_v33 = vrot.slane %v1307_v32, 4  ;;  %v1309_v34 = vpop.f32.mrb[10].mxu1 }
 0x33f   :  { %v1356_v35 = vadd.f32 %v1355_v31, %v1305_v30  ;;  %v1310_v36 = vpop.f32.mrb[11].mxu1 }
 0x340   :  { %v1362_v37 = vadd.f32 %v1361_v33, %v1307_v32 }
 0x341   :  { %v1357_v38 = vrot.slane %v1356_v35, 2 }
 0x342   :  { %v1363_v39 = vrot.slane %v1362_v37, 2 }
 0x343   :  { %v1358_v42 = vadd.f32 %v1357_v38, %v1356_v35 }
 0x344   :  { %v1364_v44 = vadd.f32 %v1363_v39, %v1362_v37 }
 0x345   :  { %v1359_v45 = vrot.slane %v1358_v42, 1 }
 0x346   :  { %v1365_v46 = vrot.slane %v1364_v44, 1 }
 0x347   :  { %v1360_v47 = vadd.f32 %v1359_v45, %v1358_v42 }
 0x348   :  { %v1366_v48 = vadd.f32 %v1365_v46, %v1364_v44 }
 0x349   :  { %v1379_v49 = vmul.f32 0.125, %v1360_v47 }
 0x34a   :  { %v1380_v50 = vmul.f32 0.125, %v1366_v48 }
 0x34b   :  { %v1383_v51 = vsub.f32 %v1305_v30, %v1379_v49 }
 0x34c   :  { %v1384_v52 = vsub.f32 %v1307_v32, %v1380_v50 }
 0x34d   :  { %v1387_v53 = vmul.f32 %v1383_v51, %v1383_v51 }
 0x34e   :  { %v1388_v54 = vmul.f32 %v1384_v52, %v1384_v52 }
 0x34f   :  { %v1391_v55 = vrot.slane %v1387_v53, 4 }
 0x350   :  { %v1397_v56 = vrot.slane %v1388_v54, 4 }
 0x351   :  { %v1392_v57 = vadd.f32 %v1391_v55, %v1387_v53 }
 0x352   :  { %v1398_v58 = vadd.f32 %v1397_v56, %v1388_v54 }
 0x353   :  { %v1393_v59 = vrot.slane %v1392_v57, 2 }
 0x354   :  { %v1399_v60 = vrot.slane %v1398_v58, 2 }
 0x355   :  { %v1394_v61 = vadd.f32 %v1393_v59, %v1392_v57 }
 0x356   :  { %v1400_v62 = vadd.f32 %v1399_v60, %v1398_v58 }
 0x357   :  { %v1395_v63 = vrot.slane %v1394_v61, 1 }
 0x358   :  { %v1401_v0 = vrot.slane %v1400_v62, 1 }
 0x359   :  { %v1396_v1 = vadd.f32 %v1395_v63, %v1394_v61 }
 0x35a   :  { %v1402_v2 = vadd.f32 %v1401_v0, %v1400_v62 }
 0x35b   :  { %v1415_v3 = vmul.f32 0.125, %v1396_v1 }
 0x35c   :  { %v1416_v4 = vmul.f32 0.125, %v1402_v2  ;;  %v3449_v2 = vsub.s32 2, %v3406_v40 }
 0x35d   :  { %v1419_v5 = vadd.f32 0.8, %v1415_v3  ;;  %v3452_v3 = vsub.s32 3, %v3406_v40 }
 0x35e   :  { %v1420_v6 = vadd.f32 0.8, %v1416_v4  ;;  %v1443_v4 = vrot.slane %v3431_v7, %v3449_v2 }
 0x35f   :  { %3130 = vrsqrt.f32 %v1419_v5 }
 0x360   :  { %3132 = vrsqrt.f32 %v1420_v6  ;;  %v1447_v6 = vrot.slane %v3431_v7, %v3452_v3 }
 0x369   :  { %v3131_v10 = vpop.eup %3130 }
 0x36a   :  { %v3133_v12 = vpop.eup %3132  ;;  %v1427_v13 = vmul.f32 %v3131_v10, %v1383_v51 }
 0x36b   :  { %v1428_v15 = vmul.f32 %v3133_v12, %v1384_v52 }
 0x36c   :  { %v1452_v17 = vmul.f32 %v1435_v9, %v1427_v13  ;;  %v1472_v13 = vrot.slane %v3436_v8, %v3452_v3 }
 0x36d   :  { %v1453_v18 = vmul.f32 %v1439_v11, %v1428_v15  ;;  %v1468_v11 = vrot.slane %v3436_v8, %v3449_v2 }
 0x36e   :  { %v1477_v19 = vadd.f32 %v1460_v14, %v1452_v17 }
 0x36f   :  { %v1478_v20 = vadd.f32 %v1464_v16, %v1453_v18 }
 0x370   :  { %vm1481_vm3 = vcmp.gt.f32.partialorder %v1477_v19, 0.0  ;;  %v1485_v21 = vmul.f32 0.2, %v1477_v19 }
 0x371   :  { %vm1482_vm4 = vcmp.gt.f32.partialorder %v1478_v20, 0.0  ;;  %v1486_v22 = vmul.f32 0.2, %v1478_v20 }
 0x372   :  { %v3446_v23 = vsel %vm1481_vm3, %v1477_v19, %v1485_v21 }
 0x373   :  { %v1490_v24 = vsel %vm1482_vm4, %v1478_v20, %v1486_v22 }
 0x37c   :  { %v1346_v25 = vpop.f32.mrb[12].mxu1 }
 0x37d   :  { %v1367_v26 = vrot.slane %v1346_v25, 4  ;;  %v1348_v27 = vpop.f32.mrb[13].mxu1 }
 0x37e   :  { %v1373_v28 = vrot.slane %v1348_v27, 4  ;;  %v1350_v29 = vpop.f32.mrb[14].mxu1 }
 0x37f   :  { %v1368_v30 = vadd.f32 %v1367_v26, %v1346_v25  ;;  %v1351_v31 = vpop.f32.mrb[15].mxu1 }
 0x380   :  { %v1374_v32 = vadd.f32 %v1373_v28, %v1348_v27 }
 0x381   :  { %v1369_v33 = vrot.slane %v1368_v30, 2 }
 0x382   :  { %v1375_v34 = vrot.slane %v1374_v32, 2 }
 0x383   :  { %v1370_v35 = vadd.f32 %v1369_v33, %v1368_v30 }
 0x384   :  { %v1376_v36 = vadd.f32 %v1375_v34, %v1374_v32 }
 0x385   :  { %v1371_v37 = vrot.slane %v1370_v35, 1 }
 0x386   :  { %v1377_v38 = vrot.slane %v1376_v36, 1 }
 0x387   :  { %v1372_v39 = vadd.f32 %v1371_v37, %v1370_v35 }
 0x388   :  { %v1378_v42 = vadd.f32 %v1377_v38, %v1376_v36 }
 0x389   :  { %v1381_v44 = vmul.f32 0.125, %v1372_v39 }
 0x38a   :  { %v1382_v45 = vmul.f32 0.125, %v1378_v42 }
 0x38b   :  { %v1385_v46 = vsub.f32 %v1346_v25, %v1381_v44 }
 0x38c   :  { %v1386_v47 = vsub.f32 %v1348_v27, %v1382_v45 }
 0x38d   :  { %v1389_v48 = vmul.f32 %v1385_v46, %v1385_v46 }
 0x38e   :  { %v1390_v49 = vmul.f32 %v1386_v47, %v1386_v47 }
 0x38f   :  { %v1403_v50 = vrot.slane %v1389_v48, 4 }
 0x390   :  { %v1409_v51 = vrot.slane %v1390_v49, 4 }
 0x391   :  { %v1404_v52 = vadd.f32 %v1403_v50, %v1389_v48 }
 0x392   :  { %v1410_v53 = vadd.f32 %v1409_v51, %v1390_v49 }
 0x393   :  { %v1405_v54 = vrot.slane %v1404_v52, 2 }
 0x394   :  { %v1411_v55 = vrot.slane %v1410_v53, 2 }
 0x395   :  { %v1406_v56 = vadd.f32 %v1405_v54, %v1404_v52 }
 0x396   :  { %v1412_v57 = vadd.f32 %v1411_v55, %v1410_v53 }
 0x397   :  { %v1407_v58 = vrot.slane %v1406_v56, 1 }
 0x398   :  { %v1413_v59 = vrot.slane %v1412_v57, 1 }
 0x399   :  { %v1408_v60 = vadd.f32 %v1407_v58, %v1406_v56 }
 0x39a   :  { %v1414_v61 = vadd.f32 %v1413_v59, %v1412_v57 }
 0x39b   :  { %v1417_v62 = vmul.f32 0.125, %v1408_v60 }
 0x39c   :  { %v1418_v63 = vmul.f32 0.125, %v1414_v61 }
 0x39d   :  { %v1421_v0 = vadd.f32 0.8, %v1417_v62 }
 0x39e   :  { %v1422_v1 = vadd.f32 0.8, %v1418_v63 }
 0x39f   :  { %3134 = vrsqrt.f32 %v1421_v0 }
 0x3a0   :  { %3136 = vrsqrt.f32 %v1422_v1 }
 0x3a9   :  { %v3135_v5 = vpop.eup %3134 }
 0x3aa   :  { %v3137_v9 = vpop.eup %3136  ;;  %v1429_v10 = vmul.f32 %v3135_v5, %v1385_v46 }
 0x3ab   :  { %v1430_v12 = vmul.f32 %v3137_v9, %v1386_v47 }
 0x3ac   :  { %v1454_v14 = vmul.f32 %v1443_v4, %v1429_v10 }
 0x3ad   :  { %v1455_v15 = vmul.f32 %v1447_v6, %v1430_v12 }
 0x3ae   :  { %v1479_v16 = vadd.f32 %v1468_v11, %v1454_v14 }
 0x3af   :  { %v1480_v17 = vadd.f32 %v1472_v13, %v1455_v15 }
 0x3b0   :  { %vm1483_vm5 = vcmp.gt.f32.partialorder %v1479_v16, 0.0  ;;  %v1487_v18 = vmul.f32 0.2, %v1479_v16 }
 0x3b1   :  { %vm1484_vm6 = vcmp.gt.f32.partialorder %v1480_v17, 0.0  ;;  %v1488_v19 = vmul.f32 0.2, %v1480_v17 }
 0x3b2   :  { %v3462_v20 = vsel %vm1483_vm5, %v1479_v16, %v1487_v18 }
 0x3b3   :  { %v1492_v7 = vsel %vm1484_vm6, %v1480_v17, %v1488_v19 }
 0x3b4   :  { %3206 = dma.done.wait [#allocation4], 32768 }
 0x3b5   :  { %3207 = vsyncadd [#allocation4], 4294934528  ;;  %v3464_v21 = vpack.c.bf16 %v1490_v24, %v1490_v24  ;;  %v3466_v22 = vpack.c.bf16 %v1492_v7, %v1492_v7  ;;  %v1502_v8 = vld [vmem:[#allocation2 + $0x8] sm:$0xff]  ;;  %v1501_v26 = vld [vmem:[#allocation2] sm:$0xff] }
 0x3b6   :  { %v1630_v25 = vld [vmem:[#allocation2 + $0x408] sm:$0xff]  ;;  %1757 = vmatprep.subr.bf16.mxu1 %v1502_v8  ;;  %v1629_v27 = vld [vmem:[#allocation2 + $0x400] sm:$0xff] }
 0x3b7   :  { %1789 = vmatprep.mubr.bf16.mxu1 %v3464_v21  ;;  %1830 = vmatprep.mubr.bf16.mxu0 %v3466_v22  ;;  %v1510_v28 = vld [vmem:[#allocation2 + $0x48] sm:$0xff]  ;;  %v1509_v24 = vld [vmem:[#allocation2 + $0x40] sm:$0xff] }
 0x3b8   :  { %1798 = vmatprep.subr.bf16.mxu0 %v1630_v25  ;;  %v1638_v29 = vld [vmem:[#allocation2 + $0x448] sm:$0xff]  ;;  %1758 = vmatpush1.bf16.msra.mxu1 %v1501_v26  ;;  %v1637_v30 = vld [vmem:[#allocation2 + $0x440] sm:$0xff] }
 0x3b9   :  { %1799 = vmatpush1.bf16.msra.mxu0 %v1629_v27  ;;  %1759 = vmatprep.subr.bf16.mxu1 %v1510_v28  ;;  %v1518_v31 = vld [vmem:[#allocation2 + $0x88] sm:$0xff]  ;;  %v1517_v33 = vld [vmem:[#allocation2 + $0x80] sm:$0xff] }
 0x3ba   :  { %1800 = vmatprep.subr.bf16.mxu0 %v1638_v29  ;;  %v1646_v32 = vld [vmem:[#allocation2 + $0x488] sm:$0xff]  ;;  %v1645_v34 = vld [vmem:[#allocation2 + $0x480] sm:$0xff] }
 0x3bb   :  { %v1526_v35 = vld [vmem:[#allocation2 + $0xc8] sm:$0xff]  ;;  %v1525_v37 = vld [vmem:[#allocation2 + $0xc0] sm:$0xff] }
 0x3bc   :  { %1760 = vmatpush1.bf16.msra.mxu1 %v1509_v24  ;;  %v1654_v36 = vld [vmem:[#allocation2 + $0x4c8] sm:$0xff]  ;;  %v1653_v38 = vld [vmem:[#allocation2 + $0x4c0] sm:$0xff] }
 0x3bd   :  { %1801 = vmatpush1.bf16.msra.mxu0 %v1637_v30  ;;  %1761 = vmatprep.subr.bf16.mxu1 %v1518_v31  ;;  %v1534_v39 = vld [vmem:[#allocation2 + $0x108] sm:$0xff]  ;;  %v1533_v44 = vld [vmem:[#allocation2 + $0x100] sm:$0xff] }
 0x3be   :  { %1802 = vmatprep.subr.bf16.mxu0 %v1646_v32  ;;  %v1662_v42 = vld [vmem:[#allocation2 + $0x508] sm:$0xff]  ;;  %v1661_v45 = vld [vmem:[#allocation2 + $0x500] sm:$0xff]  ;;  %v1504_v32 = vld [vmem:[#allocation2 + $0x18] sm:$0xff] }
 0x3bf   :  { %v1542_v46 = vld [vmem:[#allocation2 + $0x148] sm:$0xff]  ;;  %v1541_v48 = vld [vmem:[#allocation2 + $0x140] sm:$0xff] }
 0x3c0   :  { %1762 = vmatpush1.bf16.msra.mxu1 %v1517_v33  ;;  %v1670_v47 = vld [vmem:[#allocation2 + $0x548] sm:$0xff]  ;;  %v1669_v49 = vld [vmem:[#allocation2 + $0x540] sm:$0xff] }
 0x3c1   :  { %1803 = vmatpush1.bf16.msra.mxu0 %v1645_v34  ;;  %1763 = vmatprep.subr.bf16.mxu1 %v1526_v35  ;;  %v1550_v50 = vld [vmem:[#allocation2 + $0x188] sm:$0xff]  ;;  %v1549_v52 = vld [vmem:[#allocation2 + $0x180] sm:$0xff]  ;;  %v3472_v34 = vpack.c.bf16 %v3446_v23, %v3446_v23  ;;  %v3476_v35 = vpack.c.bf16 %v3462_v20, %v3462_v20  ;;  %v1511_v23 = vld [vmem:[#allocation2 + $0x50] sm:$0xff] }
 0x3c2   :  { %1804 = vmatprep.subr.bf16.mxu0 %v1654_v36  ;;  %v1678_v51 = vld [vmem:[#allocation2 + $0x588] sm:$0xff]  ;;  %v1677_v53 = vld [vmem:[#allocation2 + $0x580] sm:$0xff]  ;;  %v1503_v36 = vld [vmem:[#allocation2 + $0x10] sm:$0xff] }
 0x3c3   :  { %v1558_v54 = vld [vmem:[#allocation2 + $0x1c8] sm:$0xff]  ;;  %v1557_v56 = vld [vmem:[#allocation2 + $0x1c0] sm:$0xff]  ;;  %v1520_v20 = vld [vmem:[#allocation2 + $0x98] sm:$0xff] }
 0x3c4   :  { %1764 = vmatpush1.bf16.msra.mxu1 %v1525_v37  ;;  %v1686_v55 = vld [vmem:[#allocation2 + $0x5c8] sm:$0xff]  ;;  %v1685_v57 = vld [vmem:[#allocation2 + $0x5c0] sm:$0xff] }
 0x3c5   :  { %1805 = vmatpush1.bf16.msra.mxu0 %v1653_v38  ;;  %1765 = vmatprep.subr.bf16.mxu1 %v1534_v39  ;;  %v1566_v58 = vld [vmem:[#allocation2 + $0x208] sm:$0xff]  ;;  %v1565_v60 = vld [vmem:[#allocation2 + $0x200] sm:$0xff]  ;;  %v1512_v38 = vld [vmem:[#allocation2 + $0x58] sm:$0xff] }
 0x3c6   :  { %1806 = vmatprep.subr.bf16.mxu0 %v1662_v42  ;;  %v1694_v59 = vld [vmem:[#allocation2 + $0x608] sm:$0xff]  ;;  %v1693_v61 = vld [vmem:[#allocation2 + $0x600] sm:$0xff] }
 0x3c7   :  { %v1574_v62 = vld [vmem:[#allocation2 + $0x248] sm:$0xff]  ;;  %v1573_v0 = vld [vmem:[#allocation2 + $0x240] sm:$0xff] }
 0x3c8   :  { %1766 = vmatpush1.bf16.msra.mxu1 %v1533_v44  ;;  %v1702_v63 = vld [vmem:[#allocation2 + $0x648] sm:$0xff]  ;;  %v1701_v1 = vld [vmem:[#allocation2 + $0x640] sm:$0xff] }
 0x3c9   :  { %1807 = vmatpush1.bf16.msra.mxu0 %v1661_v45  ;;  %1767 = vmatprep.subr.bf16.mxu1 %v1542_v46  ;;  %v1582_v4 = vld [vmem:[#allocation2 + $0x288] sm:$0xff]  ;;  %v1581_v6 = vld [vmem:[#allocation2 + $0x280] sm:$0xff]  ;;  %v1519_v45 = vld [vmem:[#allocation2 + $0x90] sm:$0xff] }
 0x3ca   :  { %1808 = vmatprep.subr.bf16.mxu0 %v1670_v47  ;;  %v1710_v5 = vld [vmem:[#allocation2 + $0x688] sm:$0xff]  ;;  %v1709_v9 = vld [vmem:[#allocation2 + $0x680] sm:$0xff]  ;;  %v1528_v47 = vld [vmem:[#allocation2 + $0xd8] sm:$0xff] }
 0x3cb   :  { %v1590_v10 = vld [vmem:[#allocation2 + $0x2c8] sm:$0xff]  ;;  %v1589_v12 = vld [vmem:[#allocation2 + $0x2c0] sm:$0xff] }
 0x3cc   :  { %1768 = vmatpush1.bf16.msra.mxu1 %v1541_v48  ;;  %v1718_v11 = vld [vmem:[#allocation2 + $0x6c8] sm:$0xff]  ;;  %v1717_v13 = vld [vmem:[#allocation2 + $0x6c0] sm:$0xff] }
 0x3cd   :  { %1809 = vmatpush1.bf16.msra.mxu0 %v1669_v49  ;;  %1769 = vmatprep.subr.bf16.mxu1 %v1550_v50  ;;  %v1598_v14 = vld [vmem:[#allocation2 + $0x308] sm:$0xff]  ;;  %v1597_v16 = vld [vmem:[#allocation2 + $0x300] sm:$0xff]  ;;  %v1527_v49 = vld [vmem:[#allocation2 + $0xd0] sm:$0xff] }
 0x3ce   :  { %1810 = vmatprep.subr.bf16.mxu0 %v1678_v51  ;;  %v1726_v15 = vld [vmem:[#allocation2 + $0x708] sm:$0xff]  ;;  %v1725_v17 = vld [vmem:[#allocation2 + $0x700] sm:$0xff]  ;;  %v1536_v51 = vld [vmem:[#allocation2 + $0x118] sm:$0xff] }
 0x3cf   :  { %v1606_v18 = vld [vmem:[#allocation2 + $0x348] sm:$0xff]  ;;  %v1605_v7 = vld [vmem:[#allocation2 + $0x340] sm:$0xff] }
 0x3d0   :  { %1770 = vmatpush1.bf16.msra.mxu1 %v1549_v52  ;;  %v1734_v19 = vld [vmem:[#allocation2 + $0x748] sm:$0xff]  ;;  %v1733_v8 = vld [vmem:[#allocation2 + $0x740] sm:$0xff] }
 0x3d1   :  { %1811 = vmatpush1.bf16.msra.mxu0 %v1677_v53  ;;  %1771 = vmatprep.subr.bf16.mxu1 %v1558_v54  ;;  %v1614_v25 = vld [vmem:[#allocation2 + $0x388] sm:$0xff]  ;;  %v1613_v27 = vld [vmem:[#allocation2 + $0x380] sm:$0xff]  ;;  %v1535_v53 = vld [vmem:[#allocation2 + $0x110] sm:$0xff] }
 0x3d2   :  { %1812 = vmatprep.subr.bf16.mxu0 %v1686_v55  ;;  %v1742_v26 = vld [vmem:[#allocation2 + $0x788] sm:$0xff]  ;;  %v1741_v28 = vld [vmem:[#allocation2 + $0x780] sm:$0xff]  ;;  %v1544_v55 = vld [vmem:[#allocation2 + $0x158] sm:$0xff] }
 0x3d3   :  { %v1622_v29 = vld [vmem:[#allocation2 + $0x3c8] sm:$0xff]  ;;  %v1621_v30 = vld [vmem:[#allocation2 + $0x3c0] sm:$0xff] }
 0x3d4   :  { %1772 = vmatpush1.bf16.msra.mxu1 %v1557_v56  ;;  %v1750_v24 = vld [vmem:[#allocation2 + $0x7c8] sm:$0xff]  ;;  %v1749_v31 = vld [vmem:[#allocation2 + $0x7c0] sm:$0xff] }
 0x3d5   :  { %1813 = vmatpush1.bf16.msra.mxu0 %v1685_v57  ;;  %1773 = vmatprep.subr.bf16.mxu1 %v1566_v58  ;;  %v1506_v33 = vld [vmem:[#allocation2 + $0x28] sm:$0xff]  ;;  %v1505_v37 = vld [vmem:[#allocation2 + $0x20] sm:$0xff]  ;;  %v1543_v57 = vld [vmem:[#allocation2 + $0x150] sm:$0xff] }
 0x3d6   :  { %1814 = vmatprep.subr.bf16.mxu0 %v1694_v59  ;;  %v1514_v39 = vld [vmem:[#allocation2 + $0x68] sm:$0xff]  ;;  %v1513_v42 = vld [vmem:[#allocation2 + $0x60] sm:$0xff]  ;;  %v1552_v59 = vld [vmem:[#allocation2 + $0x198] sm:$0xff] }
 0x3d7   :  { %v1522_v44 = vld [vmem:[#allocation2 + $0xa8] sm:$0xff]  ;;  %v1521_v46 = vld [vmem:[#allocation2 + $0xa0] sm:$0xff] }
 0x3d8   :  { %1774 = vmatpush1.bf16.msra.mxu1 %v1565_v60  ;;  %v1530_v48 = vld [vmem:[#allocation2 + $0xe8] sm:$0xff]  ;;  %v1529_v50 = vld [vmem:[#allocation2 + $0xe0] sm:$0xff] }
 0x3d9   :  { %1815 = vmatpush1.bf16.msra.mxu0 %v1693_v61  ;;  %1775 = vmatprep.subr.bf16.mxu1 %v1574_v62  ;;  %v1538_v52 = vld [vmem:[#allocation2 + $0x128] sm:$0xff]  ;;  %v1537_v54 = vld [vmem:[#allocation2 + $0x120] sm:$0xff]  ;;  %v1551_v61 = vld [vmem:[#allocation2 + $0x190] sm:$0xff] }
 0x3da   :  { %1816 = vmatprep.subr.bf16.mxu0 %v1702_v63  ;;  %v1546_v56 = vld [vmem:[#allocation2 + $0x168] sm:$0xff]  ;;  %v1545_v58 = vld [vmem:[#allocation2 + $0x160] sm:$0xff]  ;;  %v1560_v63 = vld [vmem:[#allocation2 + $0x1d8] sm:$0xff] }
 0x3db   :  { %v1554_v60 = vld [vmem:[#allocation2 + $0x1a8] sm:$0xff]  ;;  %v1553_v62 = vld [vmem:[#allocation2 + $0x1a0] sm:$0xff] }
 0x3dc   :  { %1776 = vmatpush1.bf16.msra.mxu1 %v1573_v0  ;;  %v1562_v0 = vld [vmem:[#allocation2 + $0x1e8] sm:$0xff] }
 0x3dd   :  { %1817 = vmatpush1.bf16.msra.mxu0 %v1701_v1  ;;  %1777 = vmatprep.subr.bf16.mxu1 %v1582_v4  ;;  %v1559_v1 = vld [vmem:[#allocation2 + $0x1d0] sm:$0xff]  ;;  %v1561_v4 = vld [vmem:[#allocation2 + $0x1e0] sm:$0xff] }
 0x3de   :  { %1818 = vmatprep.subr.bf16.mxu0 %v1710_v5  ;;  %v1568_v5 = vld [vmem:[#allocation2 + $0x218] sm:$0xff] }
 0x3e0   :  { %1778 = vmatpush1.bf16.msra.mxu1 %v1581_v6  ;;  %v1570_v6 = vld [vmem:[#allocation2 + $0x228] sm:$0xff] }
 0x3e1   :  { %1819 = vmatpush1.bf16.msra.mxu0 %v1709_v9  ;;  %1779 = vmatprep.subr.bf16.mxu1 %v1590_v10  ;;  %v1567_v9 = vld [vmem:[#allocation2 + $0x210] sm:$0xff]  ;;  %v1569_v10 = vld [vmem:[#allocation2 + $0x220] sm:$0xff] }
 0x3e2   :  { %1820 = vmatprep.subr.bf16.mxu0 %v1718_v11  ;;  %v1576_v11 = vld [vmem:[#allocation2 + $0x258] sm:$0xff] }
 0x3e4   :  { %1780 = vmatpush1.bf16.msra.mxu1 %v1589_v12  ;;  %v1578_v12 = vld [vmem:[#allocation2 + $0x268] sm:$0xff] }
 0x3e5   :  { %1821 = vmatpush1.bf16.msra.mxu0 %v1717_v13  ;;  %1781 = vmatprep.subr.bf16.mxu1 %v1598_v14  ;;  %v1575_v13 = vld [vmem:[#allocation2 + $0x250] sm:$0xff]  ;;  %v1577_v14 = vld [vmem:[#allocation2 + $0x260] sm:$0xff] }
 0x3e6   :  { %1822 = vmatprep.subr.bf16.mxu0 %v1726_v15  ;;  %v1584_v15 = vld [vmem:[#allocation2 + $0x298] sm:$0xff] }
 0x3e8   :  { %1782 = vmatpush1.bf16.msra.mxu1 %v1597_v16  ;;  %v1586_v16 = vld [vmem:[#allocation2 + $0x2a8] sm:$0xff] }
 0x3e9   :  { %1823 = vmatpush1.bf16.msra.mxu0 %v1725_v17  ;;  %1783 = vmatprep.subr.bf16.mxu1 %v1606_v18  ;;  %v1583_v17 = vld [vmem:[#allocation2 + $0x290] sm:$0xff]  ;;  %v1585_v18 = vld [vmem:[#allocation2 + $0x2a0] sm:$0xff] }
 0x3ea   :  { %1824 = vmatprep.subr.bf16.mxu0 %v1734_v19  ;;  %v1592_v19 = vld [vmem:[#allocation2 + $0x2d8] sm:$0xff] }
 0x3ec   :  { %1784 = vmatpush1.bf16.msra.mxu1 %v1605_v7  ;;  %v1594_v7 = vld [vmem:[#allocation2 + $0x2e8] sm:$0xff] }
 0x3ed   :  { %1825 = vmatpush1.bf16.msra.mxu0 %v1733_v8  ;;  %1785 = vmatprep.subr.bf16.mxu1 %v1614_v25  ;;  %v1591_v8 = vld [vmem:[#allocation2 + $0x2d0] sm:$0xff]  ;;  %v1593_v25 = vld [vmem:[#allocation2 + $0x2e0] sm:$0xff] }
 0x3ee   :  { %1826 = vmatprep.subr.bf16.mxu0 %v1742_v26  ;;  %v1600_v26 = vld [vmem:[#allocation2 + $0x318] sm:$0xff] }
 0x3f0   :  { %1786 = vmatpush1.bf16.msra.mxu1 %v1613_v27  ;;  %v1602_v27 = vld [vmem:[#allocation2 + $0x328] sm:$0xff] }
 0x3f1   :  { %1827 = vmatpush1.bf16.msra.mxu0 %v1741_v28  ;;  %1787 = vmatprep.subr.bf16.mxu1 %v1622_v29  ;;  %v1599_v28 = vld [vmem:[#allocation2 + $0x310] sm:$0xff]  ;;  %v1601_v29 = vld [vmem:[#allocation2 + $0x320] sm:$0xff] }
 0x3f2   :  { %1828 = vmatprep.subr.bf16.mxu0 %v1750_v24  ;;  %v1608_v24 = vld [vmem:[#allocation2 + $0x358] sm:$0xff] }
 0x3f4   :  { %1788 = vmatpush1.bf16.msra.mxu1 %v1621_v30  ;;  %v1610_v30 = vld [vmem:[#allocation2 + $0x368] sm:$0xff] }
 0x3f5   :  { %1829 = vmatpush1.bf16.msra.mxu0 %v1749_v31  ;;  %1839 = vmatprep.subr.bf16.mxu1 %v1504_v32  ;;  %v1607_v31 = vld [vmem:[#allocation2 + $0x350] sm:$0xff]  ;;  %v1609_v32 = vld [vmem:[#allocation2 + $0x360] sm:$0xff] }
 0x3f6   :  { %1921 = vmatprep.subr.bf16.mxu0 %v1506_v33  ;;  %v1616_v33 = vld [vmem:[#allocation2 + $0x398] sm:$0xff] }
 0x3f7   :  { %1790 = vmatmul.mubr.bf16.vlgmr.msra.gmra.mrb[16].mxu1 %v3472_v34 }
 0x3f8   :  { %1831 = vmatmul.mubr.bf16.vlgmr.msra.gmra.mrb[8].mxu0 %v3476_v35  ;;  %1840 = vmatpush1.bf16.msra.mxu1 %v1503_v36  ;;  %v1618_v36 = vld [vmem:[#allocation2 + $0x3a8] sm:$0xff] }
 0x3f9   :  { %1922 = vmatpush1.bf16.msra.mxu0 %v1505_v37  ;;  %1841 = vmatprep.subr.bf16.mxu1 %v1512_v38  ;;  %v1615_v37 = vld [vmem:[#allocation2 + $0x390] sm:$0xff]  ;;  %v1617_v38 = vld [vmem:[#allocation2 + $0x3a0] sm:$0xff] }
 0x3fa   :  { %1923 = vmatprep.subr.bf16.mxu0 %v1514_v39  ;;  %1871 = vmatprep.mubr.bf16.mxu1 %v3464_v21  ;;  %v1624_v39 = vld [vmem:[#allocation2 + $0x3d8] sm:$0xff] }
 0x3fb   :  { %1953 = vmatprep.mubr.bf16.mxu0 %v3464_v21 }
 0x3fc   :  { %1842 = vmatpush1.bf16.msra.mxu1 %v1511_v23  ;;  %v1626_v23 = vld [vmem:[#allocation2 + $0x3e8] sm:$0xff] }
 0x3fd   :  { %1924 = vmatpush1.bf16.msra.mxu0 %v1513_v42  ;;  %1843 = vmatprep.subr.bf16.mxu1 %v1520_v20  ;;  %v1623_v42 = vld [vmem:[#allocation2 + $0x3d0] sm:$0xff]  ;;  %v1625_v20 = vld [vmem:[#allocation2 + $0x3e0] sm:$0xff] }
 0x3fe   :  { %1925 = vmatprep.subr.bf16.mxu0 %v1522_v44  ;;  %v1632_v44 = vld [vmem:[#allocation2 + $0x418] sm:$0xff] }
 0x400   :  { %1844 = vmatpush1.bf16.msra.mxu1 %v1519_v45  ;;  %v1634_v45 = vld [vmem:[#allocation2 + $0x428] sm:$0xff] }
 0x401   :  { %1926 = vmatpush1.bf16.msra.mxu0 %v1521_v46  ;;  %1845 = vmatprep.subr.bf16.mxu1 %v1528_v47  ;;  %v1631_v46 = vld [vmem:[#allocation2 + $0x410] sm:$0xff]  ;;  %v1633_v47 = vld [vmem:[#allocation2 + $0x420] sm:$0xff] }
 0x402   :  { %1927 = vmatprep.subr.bf16.mxu0 %v1530_v48  ;;  %v1640_v48 = vld [vmem:[#allocation2 + $0x458] sm:$0xff] }
 0x404   :  { %1846 = vmatpush1.bf16.msra.mxu1 %v1527_v49  ;;  %v1642_v49 = vld [vmem:[#allocation2 + $0x468] sm:$0xff] }
 0x405   :  { %1928 = vmatpush1.bf16.msra.mxu0 %v1529_v50  ;;  %1847 = vmatprep.subr.bf16.mxu1 %v1536_v51  ;;  %v1639_v50 = vld [vmem:[#allocation2 + $0x450] sm:$0xff]  ;;  %v1641_v51 = vld [vmem:[#allocation2 + $0x460] sm:$0xff] }
 0x406   :  { %1929 = vmatprep.subr.bf16.mxu0 %v1538_v52  ;;  %v1648_v52 = vld [vmem:[#allocation2 + $0x498] sm:$0xff] }
 0x408   :  { %1848 = vmatpush1.bf16.msra.mxu1 %v1535_v53  ;;  %v1650_v53 = vld [vmem:[#allocation2 + $0x4a8] sm:$0xff] }
 0x409   :  { %1930 = vmatpush1.bf16.msra.mxu0 %v1537_v54  ;;  %1849 = vmatprep.subr.bf16.mxu1 %v1544_v55  ;;  %v1647_v54 = vld [vmem:[#allocation2 + $0x490] sm:$0xff]  ;;  %v1649_v55 = vld [vmem:[#allocation2 + $0x4a0] sm:$0xff] }
 0x40a   :  { %1931 = vmatprep.subr.bf16.mxu0 %v1546_v56  ;;  %v1656_v56 = vld [vmem:[#allocation2 + $0x4d8] sm:$0xff] }
 0x40c   :  { %1850 = vmatpush1.bf16.msra.mxu1 %v1543_v57  ;;  %v1658_v57 = vld [vmem:[#allocation2 + $0x4e8] sm:$0xff] }
 0x40d   :  { %1932 = vmatpush1.bf16.msra.mxu0 %v1545_v58  ;;  %1851 = vmatprep.subr.bf16.mxu1 %v1552_v59  ;;  %v1655_v58 = vld [vmem:[#allocation2 + $0x4d0] sm:$0xff]  ;;  %v1657_v59 = vld [vmem:[#allocation2 + $0x4e0] sm:$0xff] }
 0x40e   :  { %1933 = vmatprep.subr.bf16.mxu0 %v1554_v60  ;;  %v1664_v60 = vld [vmem:[#allocation2 + $0x518] sm:$0xff] }
 0x410   :  { %1852 = vmatpush1.bf16.msra.mxu1 %v1551_v61  ;;  %v1666_v61 = vld [vmem:[#allocation2 + $0x528] sm:$0xff] }
 0x411   :  { %1934 = vmatpush1.bf16.msra.mxu0 %v1553_v62  ;;  %1853 = vmatprep.subr.bf16.mxu1 %v1560_v63  ;;  %v1663_v62 = vld [vmem:[#allocation2 + $0x510] sm:$0xff]  ;;  %v1665_v63 = vld [vmem:[#allocation2 + $0x520] sm:$0xff] }
 0x412   :  { %1935 = vmatprep.subr.bf16.mxu0 %v1562_v0  ;;  %v1672_v0 = vld [vmem:[#allocation2 + $0x558] sm:$0xff] }
 0x414   :  { %1854 = vmatpush1.bf16.msra.mxu1 %v1559_v1  ;;  %v1674_v1 = vld [vmem:[#allocation2 + $0x568] sm:$0xff] }
 0x415   :  { %1936 = vmatpush1.bf16.msra.mxu0 %v1561_v4  ;;  %1855 = vmatprep.subr.bf16.mxu1 %v1568_v5  ;;  %v1671_v4 = vld [vmem:[#allocation2 + $0x550] sm:$0xff]  ;;  %v1673_v5 = vld [vmem:[#allocation2 + $0x560] sm:$0xff] }
 0x416   :  { %1937 = vmatprep.subr.bf16.mxu0 %v1570_v6  ;;  %v1680_v6 = vld [vmem:[#allocation2 + $0x598] sm:$0xff] }
 0x418   :  { %1856 = vmatpush1.bf16.msra.mxu1 %v1567_v9  ;;  %v1682_v9 = vld [vmem:[#allocation2 + $0x5a8] sm:$0xff] }
 0x419   :  { %1938 = vmatpush1.bf16.msra.mxu0 %v1569_v10  ;;  %1857 = vmatprep.subr.bf16.mxu1 %v1576_v11  ;;  %v1679_v10 = vld [vmem:[#allocation2 + $0x590] sm:$0xff]  ;;  %v1681_v11 = vld [vmem:[#allocation2 + $0x5a0] sm:$0xff] }
 0x41a   :  { %1939 = vmatprep.subr.bf16.mxu0 %v1578_v12  ;;  %v1688_v12 = vld [vmem:[#allocation2 + $0x5d8] sm:$0xff] }
 0x41c   :  { %1858 = vmatpush1.bf16.msra.mxu1 %v1575_v13  ;;  %v1690_v13 = vld [vmem:[#allocation2 + $0x5e8] sm:$0xff] }
 0x41d   :  { %1940 = vmatpush1.bf16.msra.mxu0 %v1577_v14  ;;  %1859 = vmatprep.subr.bf16.mxu1 %v1584_v15  ;;  %v1687_v14 = vld [vmem:[#allocation2 + $0x5d0] sm:$0xff]  ;;  %v1689_v15 = vld [vmem:[#allocation2 + $0x5e0] sm:$0xff] }
 0x41e   :  { %1941 = vmatprep.subr.bf16.mxu0 %v1586_v16  ;;  %v1696_v16 = vld [vmem:[#allocation2 + $0x618] sm:$0xff] }
 0x420   :  { %1860 = vmatpush1.bf16.msra.mxu1 %v1583_v17  ;;  %v1698_v17 = vld [vmem:[#allocation2 + $0x628] sm:$0xff] }
 0x421   :  { %1942 = vmatpush1.bf16.msra.mxu0 %v1585_v18  ;;  %1861 = vmatprep.subr.bf16.mxu1 %v1592_v19  ;;  %v1695_v18 = vld [vmem:[#allocation2 + $0x610] sm:$0xff]  ;;  %v1697_v19 = vld [vmem:[#allocation2 + $0x620] sm:$0xff] }
 0x422   :  { %1943 = vmatprep.subr.bf16.mxu0 %v1594_v7  ;;  %v1704_v7 = vld [vmem:[#allocation2 + $0x658] sm:$0xff] }
 0x424   :  { %1862 = vmatpush1.bf16.msra.mxu1 %v1591_v8  ;;  %v1706_v8 = vld [vmem:[#allocation2 + $0x668] sm:$0xff] }
 0x425   :  { %1944 = vmatpush1.bf16.msra.mxu0 %v1593_v25  ;;  %1863 = vmatprep.subr.bf16.mxu1 %v1600_v26  ;;  %v1703_v25 = vld [vmem:[#allocation2 + $0x650] sm:$0xff]  ;;  %v1705_v26 = vld [vmem:[#allocation2 + $0x660] sm:$0xff] }
 0x426   :  { %1945 = vmatprep.subr.bf16.mxu0 %v1602_v27  ;;  %v1712_v27 = vld [vmem:[#allocation2 + $0x698] sm:$0xff] }
 0x428   :  { %1864 = vmatpush1.bf16.msra.mxu1 %v1599_v28  ;;  %v1714_v28 = vld [vmem:[#allocation2 + $0x6a8] sm:$0xff] }
 0x429   :  { %1946 = vmatpush1.bf16.msra.mxu0 %v1601_v29  ;;  %1865 = vmatprep.subr.bf16.mxu1 %v1608_v24  ;;  %v1711_v29 = vld [vmem:[#allocation2 + $0x690] sm:$0xff]  ;;  %v1713_v24 = vld [vmem:[#allocation2 + $0x6a0] sm:$0xff] }
 0x42a   :  { %1947 = vmatprep.subr.bf16.mxu0 %v1610_v30  ;;  %v1720_v30 = vld [vmem:[#allocation2 + $0x6d8] sm:$0xff] }
 0x42c   :  { %1866 = vmatpush1.bf16.msra.mxu1 %v1607_v31  ;;  %v1722_v31 = vld [vmem:[#allocation2 + $0x6e8] sm:$0xff] }
 0x42d   :  { %1948 = vmatpush1.bf16.msra.mxu0 %v1609_v32  ;;  %1867 = vmatprep.subr.bf16.mxu1 %v1616_v33  ;;  %v1719_v32 = vld [vmem:[#allocation2 + $0x6d0] sm:$0xff]  ;;  %v1721_v33 = vld [vmem:[#allocation2 + $0x6e0] sm:$0xff] }
 0x42e   :  { %1949 = vmatprep.subr.bf16.mxu0 %v1618_v36  ;;  %v1728_v36 = vld [vmem:[#allocation2 + $0x718] sm:$0xff] }
 0x430   :  { %1868 = vmatpush1.bf16.msra.mxu1 %v1615_v37  ;;  %v1730_v37 = vld [vmem:[#allocation2 + $0x728] sm:$0xff] }
 0x431   :  { %1950 = vmatpush1.bf16.msra.mxu0 %v1617_v38  ;;  %1869 = vmatprep.subr.bf16.mxu1 %v1624_v39  ;;  %v1727_v38 = vld [vmem:[#allocation2 + $0x710] sm:$0xff]  ;;  %v1729_v39 = vld [vmem:[#allocation2 + $0x720] sm:$0xff] }
 0x432   :  { %1951 = vmatprep.subr.bf16.mxu0 %v1626_v23  ;;  %v1736_v23 = vld [vmem:[#allocation2 + $0x758] sm:$0xff] }
 0x434   :  { %1870 = vmatpush1.bf16.msra.mxu1 %v1623_v42  ;;  %v1738_v42 = vld [vmem:[#allocation2 + $0x768] sm:$0xff] }
 0x435   :  { %1952 = vmatpush1.bf16.msra.mxu0 %v1625_v20  ;;  %1880 = vmatprep.subr.bf16.mxu1 %v1632_v44  ;;  %v1735_v20 = vld [vmem:[#allocation2 + $0x750] sm:$0xff]  ;;  %v1737_v44 = vld [vmem:[#allocation2 + $0x760] sm:$0xff] }
 0x436   :  { %1962 = vmatprep.subr.bf16.mxu0 %v1634_v45  ;;  %v1744_v45 = vld [vmem:[#allocation2 + $0x798] sm:$0xff] }
 0x437   :  { %1872 = vmatmul.mubr.bf16.vlgmr.msra.gmra.mrb[20].mxu1 %v3472_v34 }
 0x438   :  { %1954 = vmatmul.mubr.bf16.vlgmr.msra.gmra.mrb[12].mxu0 %v3472_v34  ;;  %1881 = vmatpush1.bf16.msra.mxu1 %v1631_v46  ;;  %v1746_v46 = vld [vmem:[#allocation2 + $0x7a8] sm:$0xff] }
 0x439   :  { %1963 = vmatpush1.bf16.msra.mxu0 %v1633_v47  ;;  %1882 = vmatprep.subr.bf16.mxu1 %v1640_v48  ;;  %v1743_v47 = vld [vmem:[#allocation2 + $0x790] sm:$0xff]  ;;  %v1745_v48 = vld [vmem:[#allocation2 + $0x7a0] sm:$0xff] }
 0x43a   :  { %1964 = vmatprep.subr.bf16.mxu0 %v1642_v49  ;;  %1912 = vmatprep.mubr.bf16.mxu1 %v3466_v22  ;;  %v1752_v49 = vld [vmem:[#allocation2 + $0x7d8] sm:$0xff] }
 0x43b   :  { %1994 = vmatprep.mubr.bf16.mxu0 %v3466_v22 }
 0x43c   :  { %1883 = vmatpush1.bf16.msra.mxu1 %v1639_v50  ;;  %v1754_v50 = vld [vmem:[#allocation2 + $0x7e8] sm:$0xff] }
 0x43d   :  { %1965 = vmatpush1.bf16.msra.mxu0 %v1641_v51  ;;  %1884 = vmatprep.subr.bf16.mxu1 %v1648_v52  ;;  %v1751_v51 = vld [vmem:[#allocation2 + $0x7d0] sm:$0xff]  ;;  %v1753_v52 = vld [vmem:[#allocation2 + $0x7e0] sm:$0xff] }
 0x43e   :  { %1966 = vmatprep.subr.bf16.mxu0 %v1650_v53  ;;  %v1508_v53 = vld [vmem:[#allocation2 + $0x38] sm:$0xff] }
 0x440   :  { %1885 = vmatpush1.bf16.msra.mxu1 %v1647_v54  ;;  %v1507_v54 = vld [vmem:[#allocation2 + $0x30] sm:$0xff] }
 0x441   :  { %1967 = vmatpush1.bf16.msra.mxu0 %v1649_v55  ;;  %1886 = vmatprep.subr.bf16.mxu1 %v1656_v56  ;;  %v1516_v55 = vld [vmem:[#allocation2 + $0x78] sm:$0xff]  ;;  %v1515_v56 = vld [vmem:[#allocation2 + $0x70] sm:$0xff] }
 0x442   :  { %1968 = vmatprep.subr.bf16.mxu0 %v1658_v57  ;;  %v1524_v57 = vld [vmem:[#allocation2 + $0xb8] sm:$0xff] }
 0x444   :  { %1887 = vmatpush1.bf16.msra.mxu1 %v1655_v58  ;;  %v1523_v58 = vld [vmem:[#allocation2 + $0xb0] sm:$0xff] }
 0x445   :  { %1969 = vmatpush1.bf16.msra.mxu0 %v1657_v59  ;;  %1888 = vmatprep.subr.bf16.mxu1 %v1664_v60  ;;  %v1532_v59 = vld [vmem:[#allocation2 + $0xf8] sm:$0xff]  ;;  %v1531_v60 = vld [vmem:[#allocation2 + $0xf0] sm:$0xff] }
 0x446   :  { %1970 = vmatprep.subr.bf16.mxu0 %v1666_v61  ;;  %v1540_v61 = vld [vmem:[#allocation2 + $0x138] sm:$0xff] }
 0x448   :  { %1889 = vmatpush1.bf16.msra.mxu1 %v1663_v62  ;;  %v1539_v62 = vld [vmem:[#allocation2 + $0x130] sm:$0xff] }
 0x449   :  { %1971 = vmatpush1.bf16.msra.mxu0 %v1665_v63  ;;  %1890 = vmatprep.subr.bf16.mxu1 %v1672_v0  ;;  %v1548_v63 = vld [vmem:[#allocation2 + $0x178] sm:$0xff]  ;;  %v1547_v0 = vld [vmem:[#allocation2 + $0x170] sm:$0xff] }
 0x44a   :  { %1972 = vmatprep.subr.bf16.mxu0 %v1674_v1  ;;  %v1556_v1 = vld [vmem:[#allocation2 + $0x1b8] sm:$0xff] }
 0x44c   :  { %1891 = vmatpush1.bf16.msra.mxu1 %v1671_v4  ;;  %v1564_v4 = vld [vmem:[#allocation2 + $0x1f8] sm:$0xff] }
 0x44d   :  { %1973 = vmatpush1.bf16.msra.mxu0 %v1673_v5  ;;  %1892 = vmatprep.subr.bf16.mxu1 %v1680_v6  ;;  %v1563_v5 = vld [vmem:[#allocation2 + $0x1f0] sm:$0xff]  ;;  %v1572_v6 = vld [vmem:[#allocation2 + $0x238] sm:$0xff] }
 0x44e   :  { %1974 = vmatprep.subr.bf16.mxu0 %v1682_v9  ;;  %v1571_v9 = vld [vmem:[#allocation2 + $0x230] sm:$0xff] }
 0x450   :  { %1893 = vmatpush1.bf16.msra.mxu1 %v1679_v10  ;;  %v1580_v10 = vld [vmem:[#allocation2 + $0x278] sm:$0xff] }
 0x451   :  { %1975 = vmatpush1.bf16.msra.mxu0 %v1681_v11  ;;  %1894 = vmatprep.subr.bf16.mxu1 %v1688_v12  ;;  %v1579_v11 = vld [vmem:[#allocation2 + $0x270] sm:$0xff]  ;;  %v1588_v12 = vld [vmem:[#allocation2 + $0x2b8] sm:$0xff] }
 0x452   :  { %1976 = vmatprep.subr.bf16.mxu0 %v1690_v13  ;;  %v1587_v13 = vld [vmem:[#allocation2 + $0x2b0] sm:$0xff] }
 0x454   :  { %1895 = vmatpush1.bf16.msra.mxu1 %v1687_v14  ;;  %v1596_v14 = vld [vmem:[#allocation2 + $0x2f8] sm:$0xff] }
 0x455   :  { %1977 = vmatpush1.bf16.msra.mxu0 %v1689_v15  ;;  %1896 = vmatprep.subr.bf16.mxu1 %v1696_v16  ;;  %v1595_v15 = vld [vmem:[#allocation2 + $0x2f0] sm:$0xff]  ;;  %v1604_v16 = vld [vmem:[#allocation2 + $0x338] sm:$0xff] }
 0x456   :  { %1978 = vmatprep.subr.bf16.mxu0 %v1698_v17  ;;  %v1603_v17 = vld [vmem:[#allocation2 + $0x330] sm:$0xff] }
 0x458   :  { %1897 = vmatpush1.bf16.msra.mxu1 %v1695_v18  ;;  %v1612_v18 = vld [vmem:[#allocation2 + $0x378] sm:$0xff] }
 0x459   :  { %1979 = vmatpush1.bf16.msra.mxu0 %v1697_v19  ;;  %1898 = vmatprep.subr.bf16.mxu1 %v1704_v7  ;;  %v1611_v19 = vld [vmem:[#allocation2 + $0x370] sm:$0xff]  ;;  %v1620_v7 = vld [vmem:[#allocation2 + $0x3b8] sm:$0xff] }
 0x45a   :  { %1980 = vmatprep.subr.bf16.mxu0 %v1706_v8  ;;  %v1619_v8 = vld [vmem:[#allocation2 + $0x3b0] sm:$0xff] }
 0x45c   :  { %1899 = vmatpush1.bf16.msra.mxu1 %v1703_v25  ;;  %v1628_v25 = vld [vmem:[#allocation2 + $0x3f8] sm:$0xff] }
 0x45d   :  { %1981 = vmatpush1.bf16.msra.mxu0 %v1705_v26  ;;  %1900 = vmatprep.subr.bf16.mxu1 %v1712_v27  ;;  %v1627_v26 = vld [vmem:[#allocation2 + $0x3f0] sm:$0xff]  ;;  %v1636_v27 = vld [vmem:[#allocation2 + $0x438] sm:$0xff] }
 0x45e   :  { %1982 = vmatprep.subr.bf16.mxu0 %v1714_v28  ;;  %v1635_v28 = vld [vmem:[#allocation2 + $0x430] sm:$0xff] }
 0x460   :  { %1901 = vmatpush1.bf16.msra.mxu1 %v1711_v29  ;;  %v1644_v29 = vld [vmem:[#allocation2 + $0x478] sm:$0xff] }
 0x461   :  { %1983 = vmatpush1.bf16.msra.mxu0 %v1713_v24  ;;  %1902 = vmatprep.subr.bf16.mxu1 %v1720_v30  ;;  %v1643_v24 = vld [vmem:[#allocation2 + $0x470] sm:$0xff]  ;;  %v1652_v30 = vld [vmem:[#allocation2 + $0x4b8] sm:$0xff] }
 0x462   :  { %1984 = vmatprep.subr.bf16.mxu0 %v1722_v31  ;;  %v1651_v31 = vld [vmem:[#allocation2 + $0x4b0] sm:$0xff] }
 0x464   :  { %1903 = vmatpush1.bf16.msra.mxu1 %v1719_v32  ;;  %v1660_v32 = vld [vmem:[#allocation2 + $0x4f8] sm:$0xff] }
 0x465   :  { %1985 = vmatpush1.bf16.msra.mxu0 %v1721_v33  ;;  %1904 = vmatprep.subr.bf16.mxu1 %v1728_v36  ;;  %v1659_v33 = vld [vmem:[#allocation2 + $0x4f0] sm:$0xff]  ;;  %v1668_v36 = vld [vmem:[#allocation2 + $0x538] sm:$0xff] }
 0x466   :  { %1986 = vmatprep.subr.bf16.mxu0 %v1730_v37  ;;  %v1667_v37 = vld [vmem:[#allocation2 + $0x530] sm:$0xff] }
 0x468   :  { %1905 = vmatpush1.bf16.msra.mxu1 %v1727_v38  ;;  %v1676_v38 = vld [vmem:[#allocation2 + $0x578] sm:$0xff] }
 0x469   :  { %1987 = vmatpush1.bf16.msra.mxu0 %v1729_v39  ;;  %1906 = vmatprep.subr.bf16.mxu1 %v1736_v23  ;;  %v1684_v23 = vld [vmem:[#allocation2 + $0x5b8] sm:$0xff] }
 0x46a   :  { %1988 = vmatprep.subr.bf16.mxu0 %v1738_v42 }
 0x46c   :  { %1907 = vmatpush1.bf16.msra.mxu1 %v1735_v20 }
 0x46d   :  { %1989 = vmatpush1.bf16.msra.mxu0 %v1737_v44  ;;  %1908 = vmatprep.subr.bf16.mxu1 %v1744_v45 }
 0x46e   :  { %1990 = vmatprep.subr.bf16.mxu0 %v1746_v46 }
 0x470   :  { %1909 = vmatpush1.bf16.msra.mxu1 %v1743_v47 }
 0x471   :  { %1991 = vmatpush1.bf16.msra.mxu0 %v1745_v48  ;;  %1910 = vmatprep.subr.bf16.mxu1 %v1752_v49 }
 0x472   :  { %1992 = vmatprep.subr.bf16.mxu0 %v1754_v50  ;;  %v1683_v50 = vld [vmem:[#allocation2 + $0x5b0] sm:$0xff] }
 0x474   :  { %1911 = vmatpush1.bf16.msra.mxu1 %v1751_v51 }
 0x475   :  { %1993 = vmatpush1.bf16.msra.mxu0 %v1753_v52  ;;  %2003 = vmatprep.subr.bf16.mxu1 %v1508_v53  ;;  %v1692_v53 = vld [vmem:[#allocation2 + $0x5f8] sm:$0xff] }
 0x477   :  { %1913 = vmatmul.mubr.bf16.vlgmr.msra.gmra.mrb[20].mxu1 %v3476_v35 }
 0x478   :  { %1995 = vmatmul.mubr.bf16.vlgmr.msra.gmra.mrb[12].mxu0 %v3476_v35  ;;  %2004 = vmatpush1.bf16.msra.mxu1 %v1507_v54 }
 0x479   :  { %2035 = vmatprep.mubr.bf16.mxu1 %v3464_v21  ;;  %2005 = vmatprep.subr.bf16.mxu1 %v1516_v55  ;;  %v1555_v21 = vld [vmem:[#allocation2 + $0x1b0] sm:$0xff] }
 0x47c   :  { %2006 = vmatpush1.bf16.msra.mxu1 %v1515_v56 }
 0x47d   :  { %2007 = vmatprep.subr.bf16.mxu1 %v1524_v57  ;;  %v1691_v57 = vld [vmem:[#allocation2 + $0x5f0] sm:$0xff] }
 0x480   :  { %2008 = vmatpush1.bf16.msra.mxu1 %v1523_v58 }
 0x481   :  { %2009 = vmatprep.subr.bf16.mxu1 %v1532_v59  ;;  %v1700_v59 = vld [vmem:[#allocation2 + $0x638] sm:$0xff] }
 0x484   :  { %2010 = vmatpush1.bf16.msra.mxu1 %v1531_v60 }
 0x485   :  { %2011 = vmatprep.subr.bf16.mxu1 %v1540_v61 }
 0x488   :  { %2012 = vmatpush1.bf16.msra.mxu1 %v1539_v62 }
 0x489   :  { %2013 = vmatprep.subr.bf16.mxu1 %v1548_v63  ;;  %v1699_v63 = vld [vmem:[#allocation2 + $0x630] sm:$0xff] }
 0x48c   :  { %2014 = vmatpush1.bf16.msra.mxu1 %v1547_v0 }
 0x48d   :  { %2015 = vmatprep.subr.bf16.mxu1 %v1556_v1  ;;  %v1708_v1 = vld [vmem:[#allocation2 + $0x678] sm:$0xff] }
 0x490   :  { %2016 = vmatpush1.bf16.msra.mxu1 %v1555_v21 }
 0x491   :  { %2017 = vmatprep.subr.bf16.mxu1 %v1564_v4 }
 0x494   :  { %2018 = vmatpush1.bf16.msra.mxu1 %v1563_v5 }
 0x495   :  { %2019 = vmatprep.subr.bf16.mxu1 %v1572_v6  ;;  %v1707_v6 = vld [vmem:[#allocation2 + $0x670] sm:$0xff] }
 0x498   :  { %2020 = vmatpush1.bf16.msra.mxu1 %v1571_v9 }
 0x499   :  { %2021 = vmatprep.subr.bf16.mxu1 %v1580_v10  ;;  %v1716_v10 = vld [vmem:[#allocation2 + $0x6b8] sm:$0xff] }
 0x49c   :  { %2022 = vmatpush1.bf16.msra.mxu1 %v1579_v11 }
 0x49d   :  { %2023 = vmatprep.subr.bf16.mxu1 %v1588_v12 }
 0x4a0   :  { %2024 = vmatpush1.bf16.msra.mxu1 %v1587_v13 }
 0x4a1   :  { %2025 = vmatprep.subr.bf16.mxu1 %v1596_v14  ;;  %v1715_v14 = vld [vmem:[#allocation2 + $0x6b0] sm:$0xff] }
 0x4a4   :  { %2026 = vmatpush1.bf16.msra.mxu1 %v1595_v15 }
 0x4a5   :  { %2027 = vmatprep.subr.bf16.mxu1 %v1604_v16  ;;  %v1724_v16 = vld [vmem:[#allocation2 + $0x6f8] sm:$0xff] }
 0x4a8   :  { %2028 = vmatpush1.bf16.msra.mxu1 %v1603_v17 }
 0x4a9   :  { %2029 = vmatprep.subr.bf16.mxu1 %v1612_v18 }
 0x4ac   :  { %2030 = vmatpush1.bf16.msra.mxu1 %v1611_v19 }
 0x4ad   :  { %2031 = vmatprep.subr.bf16.mxu1 %v1620_v7  ;;  %v1723_v7 = vld [vmem:[#allocation2 + $0x6f0] sm:$0xff] }
 0x4b0   :  { %2032 = vmatpush1.bf16.msra.mxu1 %v1619_v8 }
 0x4b1   :  { %2033 = vmatprep.subr.bf16.mxu1 %v1628_v25  ;;  %v1732_v25 = vld [vmem:[#allocation2 + $0x738] sm:$0xff] }
 0x4b4   :  { %2034 = vmatpush1.bf16.msra.mxu1 %v1627_v26 }
 0x4b5   :  { %2044 = vmatprep.subr.bf16.mxu1 %v1636_v27 }
 0x4b7   :  { %2036 = vmatmul.mubr.bf16.vlgmr.msra.gmra.mrb[24].mxu1 %v3472_v34  ;;  %v1675_v34 = vld [vmem:[#allocation2 + $0x570] sm:$0xff] }
 0x4b8   :  { %2045 = vmatpush1.bf16.msra.mxu1 %v1635_v28  ;;  %2076 = vmatprep.mubr.bf16.mxu1 %v3466_v22 }
 0x4b9   :  { %2046 = vmatprep.subr.bf16.mxu1 %v1644_v29  ;;  %v1731_v29 = vld [vmem:[#allocation2 + $0x730] sm:$0xff] }
 0x4bc   :  { %2047 = vmatpush1.bf16.msra.mxu1 %v1643_v24 }
 0x4bd   :  { %2048 = vmatprep.subr.bf16.mxu1 %v1652_v30  ;;  %v1740_v30 = vld [vmem:[#allocation2 + $0x778] sm:$0xff] }
 0x4c0   :  { %2049 = vmatpush1.bf16.msra.mxu1 %v1651_v31 }
 0x4c1   :  { %2050 = vmatprep.subr.bf16.mxu1 %v1660_v32 }
 0x4c4   :  { %2051 = vmatpush1.bf16.msra.mxu1 %v1659_v33 }
 0x4c5   :  { %2052 = vmatprep.subr.bf16.mxu1 %v1668_v36  ;;  %v1739_v36 = vld [vmem:[#allocation2 + $0x770] sm:$0xff] }
 0x4c8   :  { %2053 = vmatpush1.bf16.msra.mxu1 %v1667_v37 }
 0x4c9   :  { %2054 = vmatprep.subr.bf16.mxu1 %v1676_v38  ;;  %v1748_v38 = vld [vmem:[#allocation2 + $0x7b8] sm:$0xff] }
 0x4ca   :  { %v1791_v39 = vpop.f32.mrb[16].mxu1 }
 0x4cb   :  { %v1832_v22 = vpop.f32.mrb[8].mxu0  ;;  %v1793_v20 = vpop.f32.mrb[17].mxu1 }
 0x4cc   :  { %v1833_v42 = vadd.f32 %v1832_v22, %v1791_v39  ;;  %v1834_v44 = vpop.f32.mrb[9].mxu0  ;;  %v1795_v46 = vpop.f32.mrb[18].mxu1  ;;  %2055 = vmatpush1.bf16.msra.mxu1 %v1675_v34 }
 0x4cd   :  { %v1835_v45 = vadd.f32 %v1834_v44, %v1793_v20  ;;  %v1836_v47 = vpop.f32.mrb[10].mxu0  ;;  %v1796_v49 = vpop.f32.mrb[19].mxu1  ;;  %2056 = vmatprep.subr.bf16.mxu1 %v1684_v23  ;;  %v1747_v23 = vld [vmem:[#allocation2 + $0x7b0] sm:$0xff]  ;;  %v1756_v20 = vld [vmem:[#allocation2 + $0x7f8] sm:$0xff]  ;;  %v3499_v46 = vld [vmem:[%s3584_s11] sm:$0xff] }
 0x4ce   :  { %v2087_v48 = vrot.slane %v1833_v42, 4  ;;  %v1837_v51 = vpop.f32.mrb[11].mxu0  ;;  %v1755_v44 = vld [vmem:[#allocation2 + $0x7f0] sm:$0xff] }
 0x4cf   :  { %v2093_v52 = vrot.slane %v1835_v45, 4 }
 0x4d0   :  { %v2088_v54 = vadd.f32 %v2087_v48, %v1833_v42  ;;  %2057 = vmatpush1.bf16.msra.mxu1 %v1683_v50 }
 0x4d1   :  { %v2094_v55 = vadd.f32 %v2093_v52, %v1835_v45  ;;  %2058 = vmatprep.subr.bf16.mxu1 %v1692_v53  ;;  %v2292_v52 = vrot.slane %v3499_v46, %v3409_v41 }
 0x4d2   :  { %v2089_v56 = vrot.slane %v2088_v54, 2 }
 0x4d3   :  { %v2095_v58 = vrot.slane %v2094_v55, 2 }
 0x4d4   :  { %v2090_v60 = vadd.f32 %v2089_v56, %v2088_v54  ;;  %2059 = vmatpush1.bf16.msra.mxu1 %v1691_v57  ;;  %v2296_v54 = vrot.slane %v3499_v46, %v3415_v43 }
 0x4d5   :  { %v2096_v61 = vadd.f32 %v2095_v58, %v2094_v55  ;;  %2060 = vmatprep.subr.bf16.mxu1 %v1700_v59 }
 0x4d6   :  { %v2091_v62 = vrot.slane %v2090_v60, 1 }
 0x4d7   :  { %v2097_v0 = vrot.slane %v2096_v61, 1 }
 0x4d8   :  { %v2092_v21 = vadd.f32 %v2091_v62, %v2090_v60  ;;  %2061 = vmatpush1.bf16.msra.mxu1 %v1699_v63 }
 0x4d9   :  { %v2098_v4 = vadd.f32 %v2097_v0, %v2096_v61  ;;  %2062 = vmatprep.subr.bf16.mxu1 %v1708_v1 }
 0x4da   :  { %v2135_v5 = vmul.f32 0.125, %v2092_v21 }
 0x4db   :  { %v2136_v9 = vmul.f32 0.125, %v2098_v4 }
 0x4dc   :  { %v2143_v11 = vsub.f32 %v1833_v42, %v2135_v5  ;;  %2063 = vmatpush1.bf16.msra.mxu1 %v1707_v6 }
 0x4dd   :  { %v2144_v12 = vsub.f32 %v1835_v45, %v2136_v9  ;;  %2064 = vmatprep.subr.bf16.mxu1 %v1716_v10  ;;  %v3494_v45 = vld [vmem:[%s3583_s10] sm:$0xff] }
 0x4de   :  { %v2151_v13 = vmul.f32 %v2143_v11, %v2143_v11  ;;  %v2243_v47 = vrot.slane %v3494_v45, %v3409_v41  ;;  %v2247_v49 = vrot.slane %v3494_v45, %v3415_v43 }
 0x4df   :  { %v2152_v15 = vmul.f32 %v2144_v12, %v2144_v12 }
 0x4e0   :  { %v2159_v17 = vrot.slane %v2151_v13, 4  ;;  %2065 = vmatpush1.bf16.msra.mxu1 %v1715_v14 }
 0x4e1   :  { %v2165_v18 = vrot.slane %v2152_v15, 4  ;;  %2066 = vmatprep.subr.bf16.mxu1 %v1724_v16 }
 0x4e2   :  { %v2160_v19 = vadd.f32 %v2159_v17, %v2151_v13 }
 0x4e3   :  { %v2166_v8 = vadd.f32 %v2165_v18, %v2152_v15 }
 0x4e4   :  { %v2161_v26 = vrot.slane %v2160_v19, 2  ;;  %2067 = vmatpush1.bf16.msra.mxu1 %v1723_v7 }
 0x4e5   :  { %v2167_v27 = vrot.slane %v2166_v8, 2  ;;  %2068 = vmatprep.subr.bf16.mxu1 %v1732_v25 }
 0x4e6   :  { %v2162_v28 = vadd.f32 %v2161_v26, %v2160_v19 }
 0x4e7   :  { %v2168_v24 = vadd.f32 %v2167_v27, %v2166_v8 }
 0x4e8   :  { %v2163_v31 = vrot.slane %v2162_v28, 1  ;;  %2069 = vmatpush1.bf16.msra.mxu1 %v1731_v29 }
 0x4e9   :  { %v2169_v32 = vrot.slane %v2168_v24, 1  ;;  %2070 = vmatprep.subr.bf16.mxu1 %v1740_v30 }
 0x4ea   :  { %v2164_v33 = vadd.f32 %v2163_v31, %v2162_v28 }
 0x4eb   :  { %v2170_v37 = vadd.f32 %v2169_v32, %v2168_v24 }
 0x4ec   :  { %v2207_v34 = vmul.f32 0.125, %v2164_v33  ;;  %2071 = vmatpush1.bf16.msra.mxu1 %v1739_v36 }
 0x4ed   :  { %v2208_v39 = vmul.f32 0.125, %v2170_v37  ;;  %2072 = vmatprep.subr.bf16.mxu1 %v1748_v38 }
 0x4ee   :  { %v2215_v22 = vadd.f32 0.8, %v2207_v34 }
 0x4ef   :  { %v2216_v42 = vadd.f32 0.8, %v2208_v39 }
 0x4f0   :  { %3138 = vrsqrt.f32 %v2215_v22  ;;  %2073 = vmatpush1.bf16.msra.mxu1 %v1747_v23 }
 0x4f1   :  { %3140 = vrsqrt.f32 %v2216_v42  ;;  %2074 = vmatprep.subr.bf16.mxu1 %v1756_v20 }
 0x4f4   :  { %2075 = vmatpush1.bf16.msra.mxu1 %v1755_v44 }
 0x4f7   :  { %2077 = vmatmul.mubr.bf16.vlgmr.msra.gmra.mrb[24].mxu1 %v3476_v35 }
 0x4fa   :  { %v3139_v48 = vpop.eup %3138 }
 0x4fb   :  { %v3141_v50 = vpop.eup %3140  ;;  %v2231_v51 = vmul.f32 %v3139_v48, %v2143_v11 }
 0x4fc   :  { %v2232_v53 = vmul.f32 %v3141_v50, %v2144_v12 }
 0x4fd   :  { %v2280_v55 = vmul.f32 %v2243_v47, %v2231_v51 }
 0x4fe   :  { %v2281_v56 = vmul.f32 %v2247_v49, %v2232_v53 }
 0x4ff   :  { %v2329_v57 = vadd.f32 %v2292_v52, %v2280_v55 }
 0x500   :  { %v2330_v35 = vadd.f32 %v2296_v54, %v2281_v56 }
 0x501   :  { %vm2337_vm7 = vcmp.gt.f32.partialorder %v2329_v57, 0.0  ;;  %v2345_v58 = vmul.f32 0.2, %v2329_v57 }
 0x502   :  { %vm2338_vm8 = vcmp.gt.f32.partialorder %v2330_v35, 0.0  ;;  %v2346_v59 = vmul.f32 0.2, %v2330_v35 }
 0x503   :  { %v3510_v60 = vsel %vm2337_vm7, %v2329_v57, %v2345_v58 }
 0x504   :  { %v3512_v61 = vsel %vm2338_vm8, %v2330_v35, %v2346_v59 }
 0x54a   :  { %v1914_v62 = vpop.f32.mrb[20].mxu1 }
 0x54b   :  { %v1996_v63 = vpop.f32.mrb[12].mxu0  ;;  %v2099_v0 = vrot.slane %v1914_v62, 4  ;;  %v1916_v1 = vpop.f32.mrb[21].mxu1 }
 0x54c   :  { %v2111_v21 = vrot.slane %v1996_v63, 4  ;;  %v1998_v4 = vpop.f32.mrb[13].mxu0  ;;  %v2105_v5 = vrot.slane %v1916_v1, 4  ;;  %v1918_v6 = vpop.f32.mrb[22].mxu1 }
 0x54d   :  { %v2117_v9 = vrot.slane %v1998_v4, 4  ;;  %v2000_v10 = vpop.f32.mrb[14].mxu0  ;;  %v2100_v11 = vadd.f32 %v2099_v0, %v1914_v62  ;;  %v1919_v12 = vpop.f32.mrb[23].mxu1 }
 0x54e   :  { %v2112_v13 = vadd.f32 %v2111_v21, %v1996_v63  ;;  %v2001_v14 = vpop.f32.mrb[15].mxu0  ;;  %v2106_v15 = vadd.f32 %v2105_v5, %v1916_v1 }
 0x54f   :  { %v2118_v16 = vadd.f32 %v2117_v9, %v1998_v4  ;;  %v2101_v17 = vrot.slane %v2100_v11, 2 }
 0x550   :  { %v2113_v18 = vrot.slane %v2112_v13, 2  ;;  %v2107_v19 = vrot.slane %v2106_v15, 2 }
 0x551   :  { %v2119_v7 = vrot.slane %v2118_v16, 2  ;;  %v2102_v8 = vadd.f32 %v2101_v17, %v2100_v11 }
 0x552   :  { %v2114_v25 = vadd.f32 %v2113_v18, %v2112_v13  ;;  %v2108_v26 = vadd.f32 %v2107_v19, %v2106_v15 }
 0x553   :  { %v2120_v27 = vadd.f32 %v2119_v7, %v2118_v16  ;;  %v2103_v28 = vrot.slane %v2102_v8, 1 }
 0x554   :  { %v2115_v29 = vrot.slane %v2114_v25, 1  ;;  %v2109_v24 = vrot.slane %v2108_v26, 1 }
 0x555   :  { %v2121_v30 = vrot.slane %v2120_v27, 1  ;;  %v2104_v31 = vadd.f32 %v2103_v28, %v2102_v8 }
 0x556   :  { %v2116_v32 = vadd.f32 %v2115_v29, %v2114_v25  ;;  %v2110_v33 = vadd.f32 %v2109_v24, %v2108_v26  ;;  %v2258_v25 = vsub.s32 4, %v3406_v40  ;;  %v2262_v26 = vsub.s32 5, %v3406_v40 }
 0x557   :  { %v2122_v36 = vadd.f32 %v2121_v30, %v2120_v27  ;;  %v2137_v37 = vmul.f32 0.125, %v2104_v31  ;;  %v2251_v27 = vrot.slane %v3494_v45, %v3449_v2  ;;  %v2255_v29 = vrot.slane %v3494_v45, %v3452_v3 }
 0x558   :  { %v2139_v38 = vmul.f32 0.125, %v2116_v32  ;;  %v2138_v34 = vmul.f32 0.125, %v2110_v33  ;;  %v2300_v31 = vrot.slane %v3499_v46, %v3449_v2  ;;  %v2259_v32 = vrot.slane %v3494_v45, %v2258_v25 }
 0x559   :  { %v2140_v39 = vmul.f32 0.125, %v2122_v36  ;;  %v2145_v22 = vsub.f32 %v1914_v62, %v2137_v37  ;;  %v2304_v37 = vrot.slane %v3499_v46, %v3452_v3 }
 0x55a   :  { %v2147_v23 = vsub.f32 %v1996_v63, %v2139_v38  ;;  %v2146_v42 = vsub.f32 %v1916_v1, %v2138_v34  ;;  %v2263_v38 = vrot.slane %v3494_v45, %v2262_v26 }
 0x55b   :  { %v2148_v20 = vsub.f32 %v1998_v4, %v2140_v39  ;;  %v2153_v44 = vmul.f32 %v2145_v22, %v2145_v22 }
 0x55c   :  { %v2155_v47 = vmul.f32 %v2147_v23, %v2147_v23  ;;  %v2154_v48 = vmul.f32 %v2146_v42, %v2146_v42 }
 0x55d   :  { %v2156_v49 = vmul.f32 %v2148_v20, %v2148_v20  ;;  %v2171_v50 = vrot.slane %v2153_v44, 4 }
 0x55e   :  { %v2183_v51 = vrot.slane %v2155_v47, 4  ;;  %v2177_v52 = vrot.slane %v2154_v48, 4 }
 0x55f   :  { %v2189_v53 = vrot.slane %v2156_v49, 4  ;;  %v2172_v54 = vadd.f32 %v2171_v50, %v2153_v44 }
 0x560   :  { %v2184_v55 = vadd.f32 %v2183_v51, %v2155_v47  ;;  %v2178_v56 = vadd.f32 %v2177_v52, %v2154_v48  ;;  %v2308_v47 = vrot.slane %v3499_v46, %v2258_v25 }
 0x561   :  { %v2190_v57 = vadd.f32 %v2189_v53, %v2156_v49  ;;  %v2173_v35 = vrot.slane %v2172_v54, 2 }
 0x562   :  { %v2185_v58 = vrot.slane %v2184_v55, 2  ;;  %v2179_v59 = vrot.slane %v2178_v56, 2 }
 0x563   :  { %v2191_v0 = vrot.slane %v2190_v57, 2  ;;  %v2174_v62 = vadd.f32 %v2173_v35, %v2172_v54 }
 0x564   :  { %v2186_v63 = vadd.f32 %v2185_v58, %v2184_v55  ;;  %v2180_v1 = vadd.f32 %v2179_v59, %v2178_v56 }
 0x565   :  { %v2192_v21 = vadd.f32 %v2191_v0, %v2190_v57  ;;  %v2175_v4 = vrot.slane %v2174_v62, 1 }
 0x566   :  { %v2187_v5 = vrot.slane %v2186_v63, 1  ;;  %v2181_v6 = vrot.slane %v2180_v1, 1 }
 0x567   :  { %v2193_v9 = vrot.slane %v2192_v21, 1  ;;  %v2176_v10 = vadd.f32 %v2175_v4, %v2174_v62 }
 0x568   :  { %v2188_v11 = vadd.f32 %v2187_v5, %v2186_v63  ;;  %v2182_v12 = vadd.f32 %v2181_v6, %v2180_v1 }
 0x569   :  { %v2194_v13 = vadd.f32 %v2193_v9, %v2192_v21  ;;  %v2209_v14 = vmul.f32 0.125, %v2176_v10 }
 0x56a   :  { %v2211_v15 = vmul.f32 0.125, %v2188_v11  ;;  %v2210_v16 = vmul.f32 0.125, %v2182_v12 }
 0x56b   :  { %v2212_v17 = vmul.f32 0.125, %v2194_v13  ;;  %v2217_v18 = vadd.f32 0.8, %v2209_v14 }
 0x56c   :  { %v2219_v19 = vadd.f32 0.8, %v2211_v15  ;;  %v2218_v7 = vadd.f32 0.8, %v2210_v16 }
 0x56d   :  { %v2220_v8 = vadd.f32 0.8, %v2212_v17  ;;  %3142 = vrsqrt.f32 %v2217_v18 }
 0x56e   :  { %3144 = vrsqrt.f32 %v2218_v7 }
 0x56f   :  { %3146 = vrsqrt.f32 %v2219_v19 }
 0x570   :  { %3148 = vrsqrt.f32 %v2220_v8 }
 0x577   :  { %v3143_v28 = vpop.eup %3142 }
 0x578   :  { %v3145_v24 = vpop.eup %3144  ;;  %v2233_v30 = vmul.f32 %v3143_v28, %v2145_v22  ;;  %v2312_v22 = vrot.slane %v3499_v46, %v2262_v26 }
 0x579   :  { %v3147_v33 = vpop.eup %3146  ;;  %v2234_v36 = vmul.f32 %v3145_v24, %v2146_v42 }
 0x57a   :  { %v3149_v34 = vpop.eup %3148  ;;  %v2282_v39 = vmul.f32 %v2251_v27, %v2233_v30  ;;  %v2235_v44 = vmul.f32 %v3147_v33, %v2147_v23 }
 0x57b   :  { %v2283_v48 = vmul.f32 %v2255_v29, %v2234_v36  ;;  %v2236_v49 = vmul.f32 %v3149_v34, %v2148_v20 }
 0x57c   :  { %v2331_v50 = vadd.f32 %v2300_v31, %v2282_v39  ;;  %v2284_v2 = vmul.f32 %v2259_v32, %v2235_v44  ;;  %v2266_v44 = vsub.s32 6, %v3406_v40 }
 0x57d   :  { %v2332_v51 = vadd.f32 %v2304_v37, %v2283_v48  ;;  %v2285_v52 = vmul.f32 %v2263_v38, %v2236_v49 }
 0x57e   :  { %vm2339_vm9 = vcmp.gt.f32.partialorder %v2331_v50, 0.0  ;;  %v2347_v42 = vmul.f32 0.2, %v2331_v50  ;;  %v2333_v53 = vadd.f32 %v2308_v47, %v2284_v2  ;;  %v2270_v47 = vsub.s32 7, %v3406_v40 }
 0x57f   :  { %vm2340_vm10 = vcmp.gt.f32.partialorder %v2332_v51, 0.0  ;;  %v2348_v3 = vmul.f32 0.2, %v2332_v51  ;;  %v2334_v54 = vadd.f32 %v2312_v22, %v2285_v52  ;;  %v2267_v48 = vrot.slane %v3494_v45, %v2266_v44 }
 0x580   :  { %v3528_v55 = vsel %vm2339_vm9, %v2331_v50, %v2347_v42  ;;  %vm2341_vm11 = vcmp.gt.f32.partialorder %v2333_v53, 0.0  ;;  %v2349_v23 = vmul.f32 0.2, %v2333_v53  ;;  %v2271_v22 = vrot.slane %v3494_v45, %v2270_v47 }
 0x581   :  { %v3530_v56 = vsel %vm2340_vm10, %v2332_v51, %v2348_v3  ;;  %vm2342_vm12 = vcmp.gt.f32.partialorder %v2334_v54, 0.0  ;;  %v2350_v20 = vmul.f32 0.2, %v2334_v54  ;;  %v2316_v51 = vrot.slane %v3499_v46, %v2266_v44 }
 0x582   :  { %v3532_v57 = vsel %vm2341_vm11, %v2333_v53, %v2349_v23  ;;  %v2320_v42 = vrot.slane %v3499_v46, %v2270_v47 }
 0x583   :  { %v3534_v35 = vsel %vm2342_vm12, %v2334_v54, %v2350_v20 }
 0x5ca   :  { %v2078_v58 = vpop.f32.mrb[24].mxu1 }
 0x5cb   :  { %v2123_v59 = vrot.slane %v2078_v58, 4  ;;  %v2080_v0 = vpop.f32.mrb[25].mxu1 }
 0x5cc   :  { %v2129_v62 = vrot.slane %v2080_v0, 4  ;;  %v2082_v63 = vpop.f32.mrb[26].mxu1 }
 0x5cd   :  { %v2124_v1 = vadd.f32 %v2123_v59, %v2078_v58  ;;  %v2083_v21 = vpop.f32.mrb[27].mxu1 }
 0x5ce   :  { %v2130_v4 = vadd.f32 %v2129_v62, %v2080_v0 }
 0x5cf   :  { %v2125_v5 = vrot.slane %v2124_v1, 2 }
 0x5d0   :  { %v2131_v6 = vrot.slane %v2130_v4, 2 }
 0x5d1   :  { %v2126_v9 = vadd.f32 %v2125_v5, %v2124_v1 }
 0x5d2   :  { %v2132_v10 = vadd.f32 %v2131_v6, %v2130_v4 }
 0x5d3   :  { %v2127_v11 = vrot.slane %v2126_v9, 1 }
 0x5d4   :  { %v2133_v12 = vrot.slane %v2132_v10, 1 }
 0x5d5   :  { %v2128_v13 = vadd.f32 %v2127_v11, %v2126_v9 }
 0x5d6   :  { %v2134_v14 = vadd.f32 %v2133_v12, %v2132_v10 }
 0x5d7   :  { %v2141_v15 = vmul.f32 0.125, %v2128_v13 }
 0x5d8   :  { %v2142_v16 = vmul.f32 0.125, %v2134_v14 }
 0x5d9   :  { %v2149_v17 = vsub.f32 %v2078_v58, %v2141_v15 }
 0x5da   :  { %v2150_v18 = vsub.f32 %v2080_v0, %v2142_v16 }
 0x5db   :  { %v2157_v19 = vmul.f32 %v2149_v17, %v2149_v17 }
 0x5dc   :  { %v2158_v7 = vmul.f32 %v2150_v18, %v2150_v18 }
 0x5dd   :  { %v2195_v8 = vrot.slane %v2157_v19, 4 }
 0x5de   :  { %v2201_v25 = vrot.slane %v2158_v7, 4 }
 0x5df   :  { %v2196_v26 = vadd.f32 %v2195_v8, %v2157_v19 }
 0x5e0   :  { %v2202_v27 = vadd.f32 %v2201_v25, %v2158_v7 }
 0x5e1   :  { %v2197_v28 = vrot.slane %v2196_v26, 2 }
 0x5e2   :  { %v2203_v29 = vrot.slane %v2202_v27, 2 }
 0x5e3   :  { %v2198_v24 = vadd.f32 %v2197_v28, %v2196_v26 }
 0x5e4   :  { %v2204_v30 = vadd.f32 %v2203_v29, %v2202_v27 }
 0x5e5   :  { %v2199_v31 = vrot.slane %v2198_v24, 1 }
 0x5e6   :  { %v2205_v32 = vrot.slane %v2204_v30, 1 }
 0x5e7   :  { %v2200_v33 = vadd.f32 %v2199_v31, %v2198_v24 }
 0x5e8   :  { %v2206_v36 = vadd.f32 %v2205_v32, %v2204_v30 }
 0x5e9   :  { %v2213_v37 = vmul.f32 0.125, %v2200_v33 }
 0x5ea   :  { %v2214_v38 = vmul.f32 0.125, %v2206_v36 }
 0x5eb   :  { %v2221_v34 = vadd.f32 0.8, %v2213_v37 }
 0x5ec   :  { %v2222_v39 = vadd.f32 0.8, %v2214_v38 }
 0x5ed   :  { %3150 = vrsqrt.f32 %v2221_v34 }
 0x5ee   :  { %3152 = vrsqrt.f32 %v2222_v39 }
 0x5f7   :  { %v3151_v49 = vpop.eup %3150 }
 0x5f8   :  { %v3153_v50 = vpop.eup %3152  ;;  %v2237_v2 = vmul.f32 %v3151_v49, %v2149_v17 }
 0x5f9   :  { %v2238_v52 = vmul.f32 %v3153_v50, %v2150_v18 }
 0x5fa   :  { %v2286_v53 = vmul.f32 %v2267_v48, %v2237_v2 }
 0x5fb   :  { %v2287_v3 = vmul.f32 %v2271_v22, %v2238_v52 }
 0x5fc   :  { %v2335_v54 = vadd.f32 %v2316_v51, %v2286_v53 }
 0x5fd   :  { %v2336_v23 = vadd.f32 %v2320_v42, %v2287_v3 }
 0x5fe   :  { %vm2343_vm13 = vcmp.gt.f32.partialorder %v2335_v54, 0.0  ;;  %v2351_v20 = vmul.f32 0.2, %v2335_v54 }
 0x5ff   :  { %vm2344_vm14 = vcmp.gt.f32.partialorder %v2336_v23, 0.0  ;;  %v2352_v40 = vmul.f32 0.2, %v2336_v23 }
 0x600   :  { %v3542_v58 = vsel %vm2343_vm13, %v2335_v54, %v2351_v20 }
 0x601   :  { %v3544_v59 = vsel %vm2344_vm14, %v2336_v23, %v2352_v40 }
 0x602   :  { %3208 = dma.done.wait [#allocation4 + $0x1], 16384 }
 0x603   :  { %3209 = vsyncadd [#allocation4 + $0x1], 4294950912  ;;  %v2366_v45 = vpack.c.bf16 %v3512_v61, %v3512_v61  ;;  %v2374_v0 = vld [vmem:[#allocation3 + $0x8] sm:$0xff]  ;;  %v2373_v46 = vld [vmem:[#allocation3] sm:$0xff]  ;;  %v2365_v36 = vpack.c.bf16 %v3510_v60, %v3510_v60  ;;  %v2368_v37 = vpack.c.bf16 %v3530_v56, %v3530_v56 }
 0x604   :  { %v2376_v62 = vld [vmem:[#allocation3 + $0x18] sm:$0xff]  ;;  %2513 = vmatprep.subr.bf16.mxu0 %v2374_v0  ;;  %v2375_v63 = vld [vmem:[#allocation3 + $0x10] sm:$0xff]  ;;  %v2378_v1 = vld [vmem:[#allocation3 + $0x28] sm:$0xff] }
 0x605   :  { %2545 = vmatprep.mubr.bf16.mxu0 %v2366_v45  ;;  %2514 = vmatpush1.bf16.msra.mxu0 %v2373_v46  ;;  %v2377_v21 = vld [vmem:[#allocation3 + $0x20] sm:$0xff]  ;;  %v2380_v4 = vld [vmem:[#allocation3 + $0x38] sm:$0xff]  ;;  %v2379_v5 = vld [vmem:[#allocation3 + $0x30] sm:$0xff] }
 0x606   :  { %2515 = vmatprep.subr.bf16.mxu0 %v2376_v62  ;;  %v2382_v6 = vld [vmem:[#allocation3 + $0x48] sm:$0xff]  ;;  %v2381_v61 = vld [vmem:[#allocation3 + $0x40] sm:$0xff]  ;;  %v2384_v9 = vld [vmem:[#allocation3 + $0x58] sm:$0xff] }
 0x607   :  { %v2383_v10 = vld [vmem:[#allocation3 + $0x50] sm:$0xff]  ;;  %v2386_v11 = vld [vmem:[#allocation3 + $0x68] sm:$0xff]  ;;  %v2385_v12 = vld [vmem:[#allocation3 + $0x60] sm:$0xff] }
 0x608   :  { %v2388_v13 = vld [vmem:[#allocation3 + $0x78] sm:$0xff]  ;;  %v2387_v14 = vld [vmem:[#allocation3 + $0x70] sm:$0xff]  ;;  %v2390_v15 = vld [vmem:[#allocation3 + $0x88] sm:$0xff] }
 0x609   :  { %2516 = vmatpush1.bf16.msra.mxu0 %v2375_v63  ;;  %v2389_v16 = vld [vmem:[#allocation3 + $0x80] sm:$0xff]  ;;  %v2392_v17 = vld [vmem:[#allocation3 + $0x98] sm:$0xff]  ;;  %v2391_v18 = vld [vmem:[#allocation3 + $0x90] sm:$0xff] }
 0x60a   :  { %2517 = vmatprep.subr.bf16.mxu0 %v2378_v1  ;;  %v2394_v19 = vld [vmem:[#allocation3 + $0xa8] sm:$0xff]  ;;  %v2393_v7 = vld [vmem:[#allocation3 + $0xa0] sm:$0xff]  ;;  %v2396_v8 = vld [vmem:[#allocation3 + $0xb8] sm:$0xff] }
 0x60b   :  { %v2395_v25 = vld [vmem:[#allocation3 + $0xb0] sm:$0xff]  ;;  %v2398_v26 = vld [vmem:[#allocation3 + $0xc8] sm:$0xff]  ;;  %v2397_v27 = vld [vmem:[#allocation3 + $0xc0] sm:$0xff] }
 0x60c   :  { %v2400_v28 = vld [vmem:[#allocation3 + $0xd8] sm:$0xff]  ;;  %v2399_v29 = vld [vmem:[#allocation3 + $0xd0] sm:$0xff]  ;;  %v2402_v24 = vld [vmem:[#allocation3 + $0xe8] sm:$0xff] }
 0x60d   :  { %2518 = vmatpush1.bf16.msra.mxu0 %v2377_v21  ;;  %v2401_v30 = vld [vmem:[#allocation3 + $0xe0] sm:$0xff]  ;;  %v2404_v31 = vld [vmem:[#allocation3 + $0xf8] sm:$0xff]  ;;  %v2403_v32 = vld [vmem:[#allocation3 + $0xf0] sm:$0xff] }
 0x60e   :  { %2519 = vmatprep.subr.bf16.mxu0 %v2380_v4  ;;  %v2406_v33 = vld [vmem:[#allocation3 + $0x108] sm:$0xff]  ;;  %v2405_v38 = vld [vmem:[#allocation3 + $0x100] sm:$0xff]  ;;  %v2408_v34 = vld [vmem:[#allocation3 + $0x118] sm:$0xff] }
 0x60f   :  { %v2407_v39 = vld [vmem:[#allocation3 + $0x110] sm:$0xff]  ;;  %v2410_v44 = vld [vmem:[#allocation3 + $0x128] sm:$0xff]  ;;  %v2409_v47 = vld [vmem:[#allocation3 + $0x120] sm:$0xff] }
 0x610   :  { %v2412_v48 = vld [vmem:[#allocation3 + $0x138] sm:$0xff]  ;;  %v2411_v60 = vld [vmem:[#allocation3 + $0x130] sm:$0xff]  ;;  %v2414_v49 = vld [vmem:[#allocation3 + $0x148] sm:$0xff] }
 0x611   :  { %2520 = vmatpush1.bf16.msra.mxu0 %v2379_v5  ;;  %v2413_v56 = vld [vmem:[#allocation3 + $0x140] sm:$0xff]  ;;  %v2416_v22 = vld [vmem:[#allocation3 + $0x158] sm:$0xff]  ;;  %v2415_v50 = vld [vmem:[#allocation3 + $0x150] sm:$0xff] }
 0x612   :  { %2521 = vmatprep.subr.bf16.mxu0 %v2382_v6  ;;  %v2418_v2 = vld [vmem:[#allocation3 + $0x168] sm:$0xff]  ;;  %v2417_v51 = vld [vmem:[#allocation3 + $0x160] sm:$0xff]  ;;  %v2420_v52 = vld [vmem:[#allocation3 + $0x178] sm:$0xff] }
 0x613   :  { %v2419_v42 = vld [vmem:[#allocation3 + $0x170] sm:$0xff]  ;;  %v2422_v53 = vld [vmem:[#allocation3 + $0x188] sm:$0xff]  ;;  %v2421_v3 = vld [vmem:[#allocation3 + $0x180] sm:$0xff] }
 0x614   :  { %v2424_v54 = vld [vmem:[#allocation3 + $0x198] sm:$0xff]  ;;  %v2423_v23 = vld [vmem:[#allocation3 + $0x190] sm:$0xff]  ;;  %v2426_v20 = vld [vmem:[#allocation3 + $0x1a8] sm:$0xff] }
 0x615   :  { %2522 = vmatpush1.bf16.msra.mxu0 %v2381_v61  ;;  %v2425_v40 = vld [vmem:[#allocation3 + $0x1a0] sm:$0xff]  ;;  %v2428_v45 = vld [vmem:[#allocation3 + $0x1b8] sm:$0xff]  ;;  %v2427_v0 = vld [vmem:[#allocation3 + $0x1b0] sm:$0xff] }
 0x616   :  { %2523 = vmatprep.subr.bf16.mxu0 %v2384_v9  ;;  %v2430_v46 = vld [vmem:[#allocation3 + $0x1c8] sm:$0xff]  ;;  %v2429_v62 = vld [vmem:[#allocation3 + $0x1c0] sm:$0xff]  ;;  %v2432_v63 = vld [vmem:[#allocation3 + $0x1d8] sm:$0xff]  ;;  %v2367_v9 = vpack.c.bf16 %v3528_v55, %v3528_v55 }
 0x617   :  { %v2431_v1 = vld [vmem:[#allocation3 + $0x1d0] sm:$0xff]  ;;  %v2434_v21 = vld [vmem:[#allocation3 + $0x1e8] sm:$0xff]  ;;  %v2433_v4 = vld [vmem:[#allocation3 + $0x1e0] sm:$0xff] }
 0x618   :  { %v2436_v5 = vld [vmem:[#allocation3 + $0x1f8] sm:$0xff]  ;;  %v2435_v6 = vld [vmem:[#allocation3 + $0x1f0] sm:$0xff]  ;;  %v2438_v61 = vld [vmem:[#allocation3 + $0x208] sm:$0xff] }
 0x619   :  { %2524 = vmatpush1.bf16.msra.mxu0 %v2383_v10  ;;  %v2370_v10 = vpack.c.bf16 %v3534_v35, %v3534_v35  ;;  %v2443_v55 = vld [vmem:[#allocation3 + $0x230] sm:$0xff]  ;;  %v2445_v35 = vld [vmem:[#allocation3 + $0x240] sm:$0xff] }
 0x61a   :  { %2525 = vmatprep.subr.bf16.mxu0 %v2386_v11  ;;  %v2437_v11 = vld [vmem:[#allocation3 + $0x200] sm:$0xff] }
 0x61d   :  { %2526 = vmatpush1.bf16.msra.mxu0 %v2385_v12  ;;  %v2440_v12 = vld [vmem:[#allocation3 + $0x218] sm:$0xff] }
 0x61e   :  { %2527 = vmatprep.subr.bf16.mxu0 %v2388_v13  ;;  %v2439_v13 = vld [vmem:[#allocation3 + $0x210] sm:$0xff] }
 0x621   :  { %2528 = vmatpush1.bf16.msra.mxu0 %v2387_v14  ;;  %v2442_v14 = vld [vmem:[#allocation3 + $0x228] sm:$0xff] }
 0x622   :  { %2529 = vmatprep.subr.bf16.mxu0 %v2390_v15  ;;  %v2441_v15 = vld [vmem:[#allocation3 + $0x220] sm:$0xff] }
 0x625   :  { %2530 = vmatpush1.bf16.msra.mxu0 %v2389_v16  ;;  %v2444_v16 = vld [vmem:[#allocation3 + $0x238] sm:$0xff] }
 0x626   :  { %2531 = vmatprep.subr.bf16.mxu0 %v2392_v17  ;;  %v2446_v17 = vld [vmem:[#allocation3 + $0x248] sm:$0xff] }
 0x629   :  { %2532 = vmatpush1.bf16.msra.mxu0 %v2391_v18  ;;  %v2448_v18 = vld [vmem:[#allocation3 + $0x258] sm:$0xff] }
 0x62a   :  { %2533 = vmatprep.subr.bf16.mxu0 %v2394_v19  ;;  %v2447_v19 = vld [vmem:[#allocation3 + $0x250] sm:$0xff] }
 0x62d   :  { %2534 = vmatpush1.bf16.msra.mxu0 %v2393_v7  ;;  %v2450_v7 = vld [vmem:[#allocation3 + $0x268] sm:$0xff] }
 0x62e   :  { %2535 = vmatprep.subr.bf16.mxu0 %v2396_v8  ;;  %v2449_v8 = vld [vmem:[#allocation3 + $0x260] sm:$0xff] }
 0x631   :  { %2536 = vmatpush1.bf16.msra.mxu0 %v2395_v25  ;;  %v2452_v25 = vld [vmem:[#allocation3 + $0x278] sm:$0xff] }
 0x632   :  { %2537 = vmatprep.subr.bf16.mxu0 %v2398_v26  ;;  %v2451_v26 = vld [vmem:[#allocation3 + $0x270] sm:$0xff] }
 0x635   :  { %2538 = vmatpush1.bf16.msra.mxu0 %v2397_v27  ;;  %v2454_v27 = vld [vmem:[#allocation3 + $0x288] sm:$0xff] }
 0x636   :  { %2539 = vmatprep.subr.bf16.mxu0 %v2400_v28  ;;  %v2453_v28 = vld [vmem:[#allocation3 + $0x280] sm:$0xff] }
 0x639   :  { %2540 = vmatpush1.bf16.msra.mxu0 %v2399_v29  ;;  %v2456_v29 = vld [vmem:[#allocation3 + $0x298] sm:$0xff] }
 0x63a   :  { %2541 = vmatprep.subr.bf16.mxu0 %v2402_v24  ;;  %v2455_v24 = vld [vmem:[#allocation3 + $0x290] sm:$0xff] }
 0x63d   :  { %2542 = vmatpush1.bf16.msra.mxu0 %v2401_v30  ;;  %v2458_v30 = vld [vmem:[#allocation3 + $0x2a8] sm:$0xff] }
 0x63e   :  { %2543 = vmatprep.subr.bf16.mxu0 %v2404_v31  ;;  %v2457_v31 = vld [vmem:[#allocation3 + $0x2a0] sm:$0xff] }
 0x641   :  { %2544 = vmatpush1.bf16.msra.mxu0 %v2403_v32  ;;  %v2460_v32 = vld [vmem:[#allocation3 + $0x2b8] sm:$0xff] }
 0x642   :  { %2554 = vmatprep.subr.bf16.mxu0 %v2406_v33  ;;  %v2459_v33 = vld [vmem:[#allocation3 + $0x2b0] sm:$0xff] }
 0x644   :  { %2546 = vmatmul.mubr.bf16.vlgmr.msra.gmra.mrb[16].mxu0 %v2365_v36  ;;  %v2462_v36 = vld [vmem:[#allocation3 + $0x2c8] sm:$0xff] }
 0x645   :  { %2555 = vmatpush1.bf16.msra.mxu0 %v2405_v38  ;;  %2586 = vmatprep.mubr.bf16.mxu0 %v2368_v37  ;;  %v2461_v37 = vld [vmem:[#allocation3 + $0x2c0] sm:$0xff]  ;;  %v2464_v38 = vld [vmem:[#allocation3 + $0x2d8] sm:$0xff] }
 0x646   :  { %2556 = vmatprep.subr.bf16.mxu0 %v2408_v34  ;;  %v2463_v34 = vld [vmem:[#allocation3 + $0x2d0] sm:$0xff] }
 0x649   :  { %2557 = vmatpush1.bf16.msra.mxu0 %v2407_v39  ;;  %v2466_v39 = vld [vmem:[#allocation3 + $0x2e8] sm:$0xff] }
 0x64a   :  { %2558 = vmatprep.subr.bf16.mxu0 %v2410_v44  ;;  %v2465_v44 = vld [vmem:[#allocation3 + $0x2e0] sm:$0xff] }
 0x64d   :  { %2559 = vmatpush1.bf16.msra.mxu0 %v2409_v47  ;;  %v2468_v47 = vld [vmem:[#allocation3 + $0x2f8] sm:$0xff] }
 0x64e   :  { %2560 = vmatprep.subr.bf16.mxu0 %v2412_v48  ;;  %v2467_v48 = vld [vmem:[#allocation3 + $0x2f0] sm:$0xff] }
 0x651   :  { %2561 = vmatpush1.bf16.msra.mxu0 %v2411_v60  ;;  %v2470_v60 = vld [vmem:[#allocation3 + $0x308] sm:$0xff] }
 0x652   :  { %2562 = vmatprep.subr.bf16.mxu0 %v2414_v49  ;;  %v2369_v49 = vpack.c.bf16 %v3532_v57, %v3532_v57  ;;  %v2475_v57 = vld [vmem:[#allocation3 + $0x330] sm:$0xff] }
 0x655   :  { %2563 = vmatpush1.bf16.msra.mxu0 %v2413_v56  ;;  %v2372_v56 = vpack.c.bf16 %v3544_v59, %v3544_v59  ;;  %v2477_v59 = vld [vmem:[#allocation3 + $0x340] sm:$0xff] }
 0x656   :  { %2564 = vmatprep.subr.bf16.mxu0 %v2416_v22  ;;  %v2469_v22 = vld [vmem:[#allocation3 + $0x300] sm:$0xff] }
 0x659   :  { %2565 = vmatpush1.bf16.msra.mxu0 %v2415_v50  ;;  %v2472_v50 = vld [vmem:[#allocation3 + $0x318] sm:$0xff] }
 0x65a   :  { %2566 = vmatprep.subr.bf16.mxu0 %v2418_v2  ;;  %v2471_v2 = vld [vmem:[#allocation3 + $0x310] sm:$0xff] }
 0x65d   :  { %2567 = vmatpush1.bf16.msra.mxu0 %v2417_v51  ;;  %v2474_v51 = vld [vmem:[#allocation3 + $0x328] sm:$0xff] }
 0x65e   :  { %2568 = vmatprep.subr.bf16.mxu0 %v2420_v52  ;;  %v2473_v52 = vld [vmem:[#allocation3 + $0x320] sm:$0xff] }
 0x661   :  { %2569 = vmatpush1.bf16.msra.mxu0 %v2419_v42  ;;  %v2476_v42 = vld [vmem:[#allocation3 + $0x338] sm:$0xff] }
 0x662   :  { %2570 = vmatprep.subr.bf16.mxu0 %v2422_v53  ;;  %v2478_v53 = vld [vmem:[#allocation3 + $0x348] sm:$0xff] }
 0x665   :  { %2571 = vmatpush1.bf16.msra.mxu0 %v2421_v3  ;;  %v2480_v3 = vld [vmem:[#allocation3 + $0x358] sm:$0xff] }
 0x666   :  { %2572 = vmatprep.subr.bf16.mxu0 %v2424_v54  ;;  %v2479_v54 = vld [vmem:[#allocation3 + $0x350] sm:$0xff] }
 0x669   :  { %2573 = vmatpush1.bf16.msra.mxu0 %v2423_v23  ;;  %v2482_v23 = vld [vmem:[#allocation3 + $0x368] sm:$0xff] }
 0x66a   :  { %2574 = vmatprep.subr.bf16.mxu0 %v2426_v20  ;;  %v2481_v20 = vld [vmem:[#allocation3 + $0x360] sm:$0xff] }
 0x66d   :  { %2575 = vmatpush1.bf16.msra.mxu0 %v2425_v40  ;;  %v2484_v40 = vld [vmem:[#allocation3 + $0x378] sm:$0xff] }
 0x66e   :  { %2576 = vmatprep.subr.bf16.mxu0 %v2428_v45  ;;  %v2483_v45 = vld [vmem:[#allocation3 + $0x370] sm:$0xff] }
 0x671   :  { %2577 = vmatpush1.bf16.msra.mxu0 %v2427_v0  ;;  %v2486_v0 = vld [vmem:[#allocation3 + $0x388] sm:$0xff] }
 0x672   :  { %2578 = vmatprep.subr.bf16.mxu0 %v2430_v46  ;;  %v2485_v46 = vld [vmem:[#allocation3 + $0x380] sm:$0xff] }
 0x675   :  { %2579 = vmatpush1.bf16.msra.mxu0 %v2429_v62  ;;  %v2488_v62 = vld [vmem:[#allocation3 + $0x398] sm:$0xff] }
 0x676   :  { %2580 = vmatprep.subr.bf16.mxu0 %v2432_v63  ;;  %v2487_v63 = vld [vmem:[#allocation3 + $0x390] sm:$0xff] }
 0x679   :  { %2581 = vmatpush1.bf16.msra.mxu0 %v2431_v1  ;;  %v2490_v1 = vld [vmem:[#allocation3 + $0x3a8] sm:$0xff] }
 0x67a   :  { %2582 = vmatprep.subr.bf16.mxu0 %v2434_v21  ;;  %v2489_v21 = vld [vmem:[#allocation3 + $0x3a0] sm:$0xff] }
 0x67d   :  { %2583 = vmatpush1.bf16.msra.mxu0 %v2433_v4  ;;  %v2492_v4 = vld [vmem:[#allocation3 + $0x3b8] sm:$0xff] }
 0x67e   :  { %2584 = vmatprep.subr.bf16.mxu0 %v2436_v5  ;;  %v2491_v5 = vld [vmem:[#allocation3 + $0x3b0] sm:$0xff] }
 0x681   :  { %2585 = vmatpush1.bf16.msra.mxu0 %v2435_v6  ;;  %v2494_v6 = vld [vmem:[#allocation3 + $0x3c8] sm:$0xff] }
 0x682   :  { %2595 = vmatprep.subr.bf16.mxu0 %v2438_v61  ;;  %v2493_v61 = vld [vmem:[#allocation3 + $0x3c0] sm:$0xff] }
 0x684   :  { %2587 = vmatmul.mubr.bf16.vlgmr.msra.gmra.mrb[16].mxu0 %v2367_v9  ;;  %v2496_v9 = vld [vmem:[#allocation3 + $0x3d8] sm:$0xff] }
 0x685   :  { %2596 = vmatpush1.bf16.msra.mxu0 %v2437_v11  ;;  %2627 = vmatprep.mubr.bf16.mxu0 %v2370_v10  ;;  %v2495_v10 = vld [vmem:[#allocation3 + $0x3d0] sm:$0xff]  ;;  %v2498_v11 = vld [vmem:[#allocation3 + $0x3e8] sm:$0xff] }
 0x686   :  { %2597 = vmatprep.subr.bf16.mxu0 %v2440_v12  ;;  %v2497_v12 = vld [vmem:[#allocation3 + $0x3e0] sm:$0xff] }
 0x689   :  { %2598 = vmatpush1.bf16.msra.mxu0 %v2439_v13  ;;  %v2500_v13 = vld [vmem:[#allocation3 + $0x3f8] sm:$0xff] }
 0x68a   :  { %2599 = vmatprep.subr.bf16.mxu0 %v2442_v14  ;;  %v2499_v14 = vld [vmem:[#allocation3 + $0x3f0] sm:$0xff] }
 0x68d   :  { %2600 = vmatpush1.bf16.msra.mxu0 %v2441_v15  ;;  %v2371_v15 = vpack.c.bf16 %v3542_v58, %v3542_v58 }
 0x68e   :  { %2601 = vmatprep.subr.bf16.mxu0 %v2444_v16  ;;  %v2501_v16 = vld [vmem:[%s3586_s13] sm:$0x3] }
 0x691   :  { %2602 = vmatpush1.bf16.msra.mxu0 %v2443_v55  ;;  %v2506_v55 = vrot.slane %v2501_v16, %v3409_v41 }
 0x692   :  { %2603 = vmatprep.subr.bf16.mxu0 %v2446_v17  ;;  %v2510_v17 = vrot.slane %v2501_v16, %v3415_v43 }
 0x695   :  { %2604 = vmatpush1.bf16.msra.mxu0 %v2445_v35 }
 0x696   :  { %2605 = vmatprep.subr.bf16.mxu0 %v2448_v18 }
 0x699   :  { %2606 = vmatpush1.bf16.msra.mxu0 %v2447_v19 }
 0x69a   :  { %2607 = vmatprep.subr.bf16.mxu0 %v2450_v7 }
 0x69d   :  { %2608 = vmatpush1.bf16.msra.mxu0 %v2449_v8 }
 0x69e   :  { %2609 = vmatprep.subr.bf16.mxu0 %v2452_v25 }
 0x6a1   :  { %2610 = vmatpush1.bf16.msra.mxu0 %v2451_v26 }
 0x6a2   :  { %2611 = vmatprep.subr.bf16.mxu0 %v2454_v27 }
 0x6a5   :  { %2612 = vmatpush1.bf16.msra.mxu0 %v2453_v28 }
 0x6a6   :  { %2613 = vmatprep.subr.bf16.mxu0 %v2456_v29 }
 0x6a9   :  { %2614 = vmatpush1.bf16.msra.mxu0 %v2455_v24 }
 0x6aa   :  { %2615 = vmatprep.subr.bf16.mxu0 %v2458_v30 }
 0x6ad   :  { %2616 = vmatpush1.bf16.msra.mxu0 %v2457_v31 }
 0x6ae   :  { %2617 = vmatprep.subr.bf16.mxu0 %v2460_v32 }
 0x6b1   :  { %2618 = vmatpush1.bf16.msra.mxu0 %v2459_v33 }
 0x6b2   :  { %2619 = vmatprep.subr.bf16.mxu0 %v2462_v36 }
 0x6b5   :  { %2620 = vmatpush1.bf16.msra.mxu0 %v2461_v37 }
 0x6b6   :  { %2621 = vmatprep.subr.bf16.mxu0 %v2464_v38 }
 0x6b9   :  { %2622 = vmatpush1.bf16.msra.mxu0 %v2463_v34 }
 0x6ba   :  { %2623 = vmatprep.subr.bf16.mxu0 %v2466_v39 }
 0x6bd   :  { %2624 = vmatpush1.bf16.msra.mxu0 %v2465_v44 }
 0x6be   :  { %2625 = vmatprep.subr.bf16.mxu0 %v2468_v47 }
 0x6c1   :  { %2626 = vmatpush1.bf16.msra.mxu0 %v2467_v48 }
 0x6c2   :  { %2636 = vmatprep.subr.bf16.mxu0 %v2470_v60 }
 0x6c4   :  { %2628 = vmatmul.mubr.bf16.vlgmr.msra.gmra.mrb[16].mxu0 %v2369_v49 }
 0x6c5   :  { %2637 = vmatpush1.bf16.msra.mxu0 %v2469_v22  ;;  %2668 = vmatprep.mubr.bf16.mxu0 %v2372_v56 }
 0x6c6   :  { %2638 = vmatprep.subr.bf16.mxu0 %v2472_v50 }
 0x6c9   :  { %2639 = vmatpush1.bf16.msra.mxu0 %v2471_v2 }
 0x6ca   :  { %2640 = vmatprep.subr.bf16.mxu0 %v2474_v51 }
 0x6cd   :  { %2641 = vmatpush1.bf16.msra.mxu0 %v2473_v52 }
 0x6ce   :  { %2642 = vmatprep.subr.bf16.mxu0 %v2476_v42 }
 0x6d1   :  { %2643 = vmatpush1.bf16.msra.mxu0 %v2475_v57 }
 0x6d2   :  { %2644 = vmatprep.subr.bf16.mxu0 %v2478_v53 }
 0x6d5   :  { %2645 = vmatpush1.bf16.msra.mxu0 %v2477_v59 }
 0x6d6   :  { %2646 = vmatprep.subr.bf16.mxu0 %v2480_v3 }
 0x6d9   :  { %2647 = vmatpush1.bf16.msra.mxu0 %v2479_v54 }
 0x6da   :  { %2648 = vmatprep.subr.bf16.mxu0 %v2482_v23 }
 0x6dd   :  { %2649 = vmatpush1.bf16.msra.mxu0 %v2481_v20 }
 0x6de   :  { %2650 = vmatprep.subr.bf16.mxu0 %v2484_v40 }
 0x6e1   :  { %2651 = vmatpush1.bf16.msra.mxu0 %v2483_v45 }
 0x6e2   :  { %2652 = vmatprep.subr.bf16.mxu0 %v2486_v0 }
 0x6e5   :  { %2653 = vmatpush1.bf16.msra.mxu0 %v2485_v46 }
 0x6e6   :  { %2654 = vmatprep.subr.bf16.mxu0 %v2488_v62 }
 0x6e9   :  { %2655 = vmatpush1.bf16.msra.mxu0 %v2487_v63 }
 0x6ea   :  { %2656 = vmatprep.subr.bf16.mxu0 %v2490_v1 }
 0x6ed   :  { %2657 = vmatpush1.bf16.msra.mxu0 %v2489_v21 }
 0x6ee   :  { %2658 = vmatprep.subr.bf16.mxu0 %v2492_v4 }
 0x6f1   :  { %2659 = vmatpush1.bf16.msra.mxu0 %v2491_v5 }
 0x6f2   :  { %2660 = vmatprep.subr.bf16.mxu0 %v2494_v6 }
 0x6f5   :  { %2661 = vmatpush1.bf16.msra.mxu0 %v2493_v61 }
 0x6f6   :  { %2662 = vmatprep.subr.bf16.mxu0 %v2496_v9 }
 0x6f9   :  { %2663 = vmatpush1.bf16.msra.mxu0 %v2495_v10 }
 0x6fa   :  { %2664 = vmatprep.subr.bf16.mxu0 %v2498_v11 }
 0x6fd   :  { %2665 = vmatpush1.bf16.msra.mxu0 %v2497_v12 }
 0x6fe   :  { %2666 = vmatprep.subr.bf16.mxu0 %v2500_v13 }
 0x701   :  { %2667 = vmatpush1.bf16.msra.mxu0 %v2499_v14 }
 0x704   :  { %2669 = vmatmul.mubr.bf16.vlgmr.msra.gmra.mrb[16].mxu0 %v2371_v15 }
 0x7d7   :  { %v2670_v35 = vpop.f32.mrb[16].mxu0 }
 0x7d8   :  { %v2908_v18 = vadd.f32 %v2670_v35, %v2506_v55  ;;  %v2672_v19 = vpop.f32.mrb[17].mxu0 }
 0x7d9   :  { %v2909_v7 = vadd.f32 %v2672_v19, %v2510_v17  ;;  %v2674_v8 = vpop.f32.mrb[18].mxu0 }
 0x7da   :  { %3154 = vtanh.f32 %v2908_v18  ;;  %v2675_v25 = vpop.f32.mrb[19].mxu0 }
 0x7db   :  { %3156 = vtanh.f32 %v2909_v7 }
 0x7e4   :  { %v3155_v26 = vpop.eup %3154 }
 0x7e5   :  { %v3157_v58 = vpop.eup %3156  ;;  %2679 = vst [vmem:[%s3587_s14] sm:$0xff] %v3155_v26 }
 0x7e6   :  { %2680 = vst [vmem:[%s3587_s14 + $0x8] sm:$0xff] %v3157_v58 }
 0x7e7   :  { %2685 = vsyncpa [#allocation6], 1 }
 0x7e8   :  { %2686 = vsyncpa [#allocation8], 1 }
 0x7e9   :  { %2687 = vsyncmov [#allocation4] }
 0x7ec   :  { %s2688_s28 = vpop.sfrf %2687 }
 0x7ed   :  { %p2838_p2 = scmp.ne.s32.totalorder %s2688_s28, 0 }
 0x7ef   :  { %2692 = shalt.err (%p2838_p2)  }
 0x7f0   :  { %2694 = vsyncmov [#allocation4 + $0x1] }
 0x7f3   :  { %s2695_s0 = vpop.sfrf %2694 }
 0x7f4   :  { %p2839_p3 = scmp.ne.s32.totalorder %s2695_s0, 0 }
 0x7f6   :  { %2699 = shalt.err (%p2839_p3)  }

</bundles_post_ra>
